<compile_context>
chip_gen: v7x
topology: tpu7x:2x2x1
jax: 0.10.0
libtpu: 0.0.40
codegen_flags: <defaults>
</compile_context>

<pallas_src>
import math

import jax
import jax.numpy as jnp
from jax.experimental import pallas as pl
from jax.experimental.pallas import tpu as pltpu

# ------------------------------ configuration ------------------------------
BATCH = 16                # demo batch (any B works; padded to BATCH_TILE)
BATCH_TILE = 8            # rows per grid step (fills f32 sublanes)
D = 32                    # shape[-1] : latent width
HID = 4 * D               # 128 : MLP hidden width
NUM_LAYERS = 10
NUM_TIME_EMB = 64         # num_time_emb_channels
N_COND = NUM_LAYERS - 1   # layers 0..8 use conditioning; the last one does not
LN_EPS = 1e-5
COND_BIAS = 1.0           # condition_bias

# packed f32 vector-table row offsets (each row is HID = 128 lanes wide)
R_B = 0                   # rows  0.. 8 : per-layer linear bias b_i
R_G = R_B + N_COND        # rows  9..17 : LayerNorm gamma_i
R_BETA = R_G + N_COND     # rows 18..26 : LayerNorm beta_i
R_BEMB = R_BETA + N_COND  # rows 27..35 : cond linear_emb bias bemb_i
R_BT0 = R_BEMB + N_COND   # row 36      : time-embed bias 0   (first D lanes)
R_BT1 = R_BT0 + 1         # row 37      : time-embed bias 1   (first D lanes)
R_B9 = R_BT1 + 1          # row 38      : final layer bias    (first D lanes)
VEC_ROWS = 40             # padded to a multiple of 8 sublanes


# ------------------------------ Pallas kernel -------------------------------
def _latent_unet_kernel(tsin_ref, x_ref, wt_ref, wemb_ref, wx_ref, wh_ref,
                        vec_ref, o_ref):
    f32 = jnp.float32
    bf16 = jnp.bfloat16

    def _sigmoid(v):
        # EUP exp + EUP approximate reciprocal (keeps the divide off the VPU)
        ev = jnp.exp(-jnp.maximum(v, -60.0))
        return pl.reciprocal(1.0 + ev, approx=True)

    def _silu(v):
        return v * _sigmoid(v)

    # --- time_embed: Linear(64, D) -> SiLU -> Linear(D, D), bf16 x bf16 -----
    bt0 = vec_ref[R_BT0:R_BT0 + 1, :D]
    bt1 = vec_ref[R_BT1:R_BT1 + 1, :D]
    tsin = tsin_ref[...].astype(bf16)
    temb = jnp.dot(tsin, wt_ref[:NUM_TIME_EMB, :],
                   preferred_element_type=f32) + bt0
    temb = _silu(temb)
    temb = jnp.dot(temb.astype(bf16), wt_ref[NUM_TIME_EMB:, :],
                   preferred_element_type=f32) + bt1

    # --- all 9 per-layer cond projections fused into one wide matmul --------
    cond_in = _silu(temb).astype(bf16)                    # shared SiLU of cond_layers
    cond_all = jnp.dot(cond_in, wemb_ref[...], preferred_element_type=f32)

    # --- all 10 x-skip projections fused into one wide matmul ---------------
    xb = x_ref[...].astype(bf16)                          # (TB, D)
    xproj = jnp.dot(xb, wx_ref[...], preferred_element_type=f32)  # (TB, 1184)

    # --- conditioning + one-pass LayerNorm + SiLU (shared by layers 0..8) ---
    def cond_ln_act(y, i):
        cond = cond_all[:, i * HID:(i + 1) * HID] + vec_ref[R_BEMB + i:R_BEMB + i + 1, :]
        y = y * (COND_BIAS + cond)
        s1 = jnp.sum(y, axis=-1, keepdims=True)           # independent XLU reductions
        s2 = jnp.sum(y * y, axis=-1, keepdims=True)
        mean = s1 * (1.0 / HID)
        var = s2 * (1.0 / HID) - mean * mean
        y = (y - mean) * jax.lax.rsqrt(var + LN_EPS)
        y = y * vec_ref[R_G + i:R_G + i + 1, :] + vec_ref[R_BETA + i:R_BETA + i + 1, :]
        return _silu(y)
        # TODO(synk): nn.Dropout(p=0.1) is stochastic in train mode; eval-mode identity here.

    # --- layer 0: no skip, no h-dot (projection already in xproj) -----------
    y = xproj[:, 0:HID] + vec_ref[R_B:R_B + 1, :]
    h = cond_ln_act(y, 0)

    # --- layers 1..8: one (TB,128)x(128,128) bf16 dot each on the chain -----
    for i in range(1, N_COND):
        y = (jnp.dot(h.astype(bf16), wh_ref[i - 1], preferred_element_type=f32)
             + xproj[:, i * HID:(i + 1) * HID]
             + vec_ref[R_B + i:R_B + i + 1, :])
        h = cond_ln_act(y, i)

    # --- last layer: cat([h, x]) -> Linear(HID + D, D); no cond/norm/act ----
    y9 = jnp.dot(h.astype(bf16), wh_ref[N_COND - 1], preferred_element_type=f32)
    o_ref[...] = (y9[:, :D]
                  + xproj[:, N_COND * HID:N_COND * HID + D]
                  + vec_ref[R_B9:R_B9 + 1, :D])


# ------------------------------ glue / wrapper ------------------------------
def timestep_embedding(t, dim=NUM_TIME_EMB, max_period=10000.0):
    """Sinusoidal timestep embedding (trivial elementwise prep, kept in glue)."""
    half = dim // 2
    freqs = jnp.exp(-math.log(max_period) * jnp.arange(half, dtype=jnp.float32) / half)
    args = t.astype(jnp.float32)[:, None] * freqs[None, :]
    return jnp.concatenate([jnp.cos(args), jnp.sin(args)], axis=-1)


def latent_unet_forward(params, x, t, *, batch_tile=BATCH_TILE):
    B = x.shape[0]
    tsin = timestep_embedding(t)                          # (B, 64) f32
    x = x.astype(jnp.float32)

    # pad batch to a multiple of the tile (no-op when already aligned)
    Bp = batch_tile * pl.cdiv(B, batch_tile)
    if Bp != B:
        x = jnp.pad(x, ((0, Bp - B), (0, 0)))
        tsin = jnp.pad(tsin, ((0, Bp - B), (0, 0)))
    grid = (Bp // batch_tile,)

    out = pl.pallas_call(
        _latent_unet_kernel,
        grid=grid,
        in_specs=[
            pl.BlockSpec((batch_tile, NUM_TIME_EMB), lambda i: (i, 0)),   # tsin (streamed)
            pl.BlockSpec((batch_tile, D), lambda i: (i, 0)),              # x    (streamed)
            pl.BlockSpec((NUM_TIME_EMB + D, D), lambda i: (0, 0)),        # wt   (resident)
            pl.BlockSpec((D, N_COND * HID), lambda i: (0, 0)),            # wemb (resident)
            pl.BlockSpec((D, N_COND * HID + D), lambda i: (0, 0)),        # wx   (resident)
            pl.BlockSpec((N_COND, HID, HID), lambda i: (0, 0, 0)),        # wh   (resident)
            pl.BlockSpec((VEC_ROWS, HID), lambda i: (0, 0)),              # vec  (resident)
        ],
        out_specs=pl.BlockSpec((batch_tile, D), lambda i: (i, 0)),
        out_shape=jax.ShapeDtypeStruct((Bp, D), jnp.float32),
        compiler_params=pltpu.CompilerParams(
            dimension_semantics=("parallel",),            # both v7x TCs
        ),
    )(tsin, x, params['wt'], params['wemb'], params['wx'], params['wh'],
      params['vec'])
    return out[:B]


# ------------------------------ parameter init ------------------------------
class _KeyGen:
    def __init__(self, key):
        self._key = key

    def __call__(self):
        self._key, sub = jax.random.split(self._key)
        return sub


def _kaiming_normal_w(key, fin, fout):
    # kaiming_normal_(nonlinearity='relu'), fan_in mode -> std = sqrt(2 / fan_in)
    return jax.random.normal(key, (fin, fout), jnp.float32) * math.sqrt(2.0 / fin)


def _default_linear_w(key, fin, fout):
    bound = 1.0 / math.sqrt(fin)
    return jax.random.uniform(key, (fin, fout), jnp.float32, -bound, bound)


def _default_linear_b(key, fin, fout):
    bound = 1.0 / math.sqrt(fin)
    return jax.random.uniform(key, (1, fout), jnp.float32, -bound, bound)


def init_latent_unet_params(key):
    kg = _KeyGen(key)

    # time_embed: Linear(64, D) -> SiLU -> Linear(D, D)  (default torch init)
    wt0 = _default_linear_w(kg(), NUM_TIME_EMB, D)
    bt0 = _default_linear_b(kg(), NUM_TIME_EMB, D)
    wt1 = _default_linear_w(kg(), D, D)
    bt1 = _default_linear_b(kg(), D, D)

    wh_list, wx_list, wemb_list = [], [], []
    b_rows, g_rows, beta_rows, bemb_rows = [], [], [], []
    for i in range(N_COND):                               # layers 0..8, act='silu'
        fin = D if i == 0 else HID + D
        w = _kaiming_normal_w(kg(), fin, HID)             # kaiming (relu gain)
        b = _default_linear_b(kg(), fin, HID)
        wemb = _kaiming_normal_w(kg(), D, HID)
        bemb = _default_linear_b(kg(), D, HID)
        if i == 0:
            wx_list.append(w)                             # full (D, HID): no skip
        else:
            wh_list.append(w[:HID, :])                    # h-rows of cat([h, x])
            wx_list.append(w[HID:, :])                    # x-rows of cat([h, x])
        b_rows.append(b)
        g_rows.append(jnp.ones((1, HID), jnp.float32))
        beta_rows.append(jnp.zeros((1, HID), jnp.float32))
        bemb_rows.append(bemb)
        wemb_list.append(wemb)

    # last layer: Linear(HID + D, D), activation=None -> default torch init
    w9 = _default_linear_w(kg(), HID + D, D)
    b9 = _default_linear_b(kg(), HID + D, D)
    wh_list.append(jnp.pad(w9[:HID, :], ((0, 0), (0, HID - D))))   # pad N to 128
    wx_list.append(w9[HID:, :])                                    # (D, D)

    def _pad_row(v):                                       # (1, n) -> (1, HID)
        return jnp.pad(v, ((0, 0), (0, HID - v.shape[1])))

    p = {}
    p['wt'] = jnp.concatenate([wt0, wt1], axis=0).astype(jnp.bfloat16)       # (96, D)
    p['wemb'] = jnp.concatenate(wemb_list, axis=1).astype(jnp.bfloat16)      # (D, 1152)
    p['wx'] = jnp.concatenate(wx_list, axis=1).astype(jnp.bfloat16)          # (D, 1184)
    p['wh'] = jnp.stack(wh_list).astype(jnp.bfloat16)                        # (9, 128, 128)
    rows = (b_rows + g_rows + beta_rows + bemb_rows
            + [_pad_row(bt0), _pad_row(bt1), _pad_row(b9),
               jnp.zeros((1, HID), jnp.float32)])
    p['vec'] = jnp.concatenate(rows, axis=0)                                  # (40, 128) f32
    assert p['vec'].shape == (VEC_ROWS, HID)
    return p


# ---------------------------------- main ------------------------------------
if __name__ == "__main__":
    root = jax.random.PRNGKey(0)
    pkey, xkey, tkey = jax.random.split(root, 3)
    params = init_latent_unet_params(pkey)
    x = jax.random.normal(xkey, (BATCH, D), jnp.float32)
    t = jax.random.randint(tkey, (BATCH,), 0, 1000).astype(jnp.float32)

    fwd = jax.jit(latent_unet_forward)
    out = fwd(params, x, t)
    jax.block_until_ready(out)

    assert out.shape == (BATCH, D)
    assert bool(jnp.all(jnp.isfinite(out)))
    print("KERNEL_OK")
</pallas_src>

<mosaic_0001>
module attributes {stable_mosaic.version = 11 : i64} {
  func.func @_latent_unet_kernel(%arg0: i32, %arg1: memref<8x64xf32, #tpu.memory_space<vmem>>, %arg2: memref<8x32xf32, #tpu.memory_space<vmem>>, %arg3: memref<96x32xbf16, #tpu.memory_space<vmem>>, %arg4: memref<32x1152xbf16, #tpu.memory_space<vmem>>, %arg5: memref<32x1184xbf16, #tpu.memory_space<vmem>>, %arg6: memref<9x128x128xbf16, #tpu.memory_space<vmem>>, %arg7: memref<40x128xf32, #tpu.memory_space<vmem>>, %arg8: memref<8x32xf32, #tpu.memory_space<vmem>>) attributes {dimension_semantics = [#tpu.dimension_semantics<parallel>], iteration_bounds = array<i64: 2>, scalar_prefetch = 0 : i64, scratch_operands = 0 : i64, tpu.core_type = #tpu.core_type<tc>, window_params = [{transform_indices = @transform_0, window_bounds = array<i64: 8, 64>}, {transform_indices = @transform_1, window_bounds = array<i64: 8, 32>}, {pipeline_mode = #tpu.pipeline_mode<synchronous>, transform_indices = @transform_2, window_bounds = array<i64: 96, 32>}, {pipeline_mode = #tpu.pipeline_mode<synchronous>, transform_indices = @transform_3, window_bounds = array<i64: 32, 1152>}, {pipeline_mode = #tpu.pipeline_mode<synchronous>, transform_indices = @transform_4, window_bounds = array<i64: 32, 1184>}, {pipeline_mode = #tpu.pipeline_mode<synchronous>, transform_indices = @transform_5, window_bounds = array<i64: 9, 128, 128>}, {pipeline_mode = #tpu.pipeline_mode<synchronous>, transform_indices = @transform_6, window_bounds = array<i64: 40, 128>}, {transform_indices = @transform_7, window_bounds = array<i64: 8, 32>}]} {
    %c36 = arith.constant 36 : index
    %c0 = arith.constant 0 : index
    %0 = vector.load %arg7[%c36, %c0] : memref<40x128xf32, #tpu.memory_space<vmem>>, vector<1x32xf32>
    %c37 = arith.constant 37 : index
    %c0_0 = arith.constant 0 : index
    %1 = vector.load %arg7[%c37, %c0_0] : memref<40x128xf32, #tpu.memory_space<vmem>>, vector<1x32xf32>
    %c0_1 = arith.constant 0 : index
    %c0_2 = arith.constant 0 : index
    %2 = vector.load %arg1[%c0_1, %c0_2] : memref<8x64xf32, #tpu.memory_space<vmem>>, vector<8x64xf32>
    %3 = arith.truncf %2 : vector<8x64xf32> to vector<8x64xbf16>
    %c0_3 = arith.constant 0 : index
    %c0_4 = arith.constant 0 : index
    %4 = vector.load %arg3[%c0_3, %c0_4] : memref<96x32xbf16, #tpu.memory_space<vmem>>, vector<64x32xbf16>
    %cst = arith.constant dense<0.000000e+00> : vector<8x32xf32>
    %5 = tpu.matmul %3, %4, %cst {dimension_numbers = #tpu.dot_dimension_numbers<[1], [0], [0], [1], [0, 0, 1, 1], [], []>} : vector<8x64xbf16>, vector<64x32xbf16>, vector<8x32xf32> -> vector<8x32xf32>
    %6 = vector.broadcast %0 : vector<1x32xf32> to vector<8x32xf32>
    %7 = arith.addf %5, %6 : vector<8x32xf32>
    %cst_5 = arith.constant -6.000000e+01 : f32
    %8 = vector.broadcast %cst_5 : f32 to vector<8x32xf32>
    %9 = arith.maximumf %7, %8 : vector<8x32xf32>
    %cst_6 = arith.constant 0.000000e+00 : f32
    %10 = vector.broadcast %cst_6 : f32 to vector<8x32xf32>
    %11 = arith.subf %10, %9 : vector<8x32xf32>
    %12 = math.exp %11 : vector<8x32xf32>
    %cst_7 = arith.constant 1.000000e+00 : f32
    %13 = vector.broadcast %cst_7 : f32 to vector<8x32xf32>
    %14 = arith.addf %13, %12 : vector<8x32xf32>
    %15 = tpu.reciprocal %14 {approx = true} : vector<8x32xf32> -> vector<8x32xf32>
    %16 = arith.mulf %7, %15 : vector<8x32xf32>
    %17 = arith.truncf %16 : vector<8x32xf32> to vector<8x32xbf16>
    %c64 = arith.constant 64 : index
    %c0_8 = arith.constant 0 : index
    %18 = vector.load %arg3[%c64, %c0_8] : memref<96x32xbf16, #tpu.memory_space<vmem>>, vector<32x32xbf16>
    %cst_9 = arith.constant dense<0.000000e+00> : vector<8x32xf32>
    %19 = tpu.matmul %17, %18, %cst_9 {dimension_numbers = #tpu.dot_dimension_numbers<[1], [0], [0], [1], [0, 0, 1, 1], [], []>} : vector<8x32xbf16>, vector<32x32xbf16>, vector<8x32xf32> -> vector<8x32xf32>
    %20 = vector.broadcast %1 : vector<1x32xf32> to vector<8x32xf32>
    %21 = arith.addf %19, %20 : vector<8x32xf32>
    %cst_10 = arith.constant -6.000000e+01 : f32
    %22 = vector.broadcast %cst_10 : f32 to vector<8x32xf32>
    %23 = arith.maximumf %21, %22 : vector<8x32xf32>
    %cst_11 = arith.constant 0.000000e+00 : f32
    %24 = vector.broadcast %cst_11 : f32 to vector<8x32xf32>
    %25 = arith.subf %24, %23 : vector<8x32xf32>
    %26 = math.exp %25 : vector<8x32xf32>
    %cst_12 = arith.constant 1.000000e+00 : f32
    %27 = vector.broadcast %cst_12 : f32 to vector<8x32xf32>
    %28 = arith.addf %27, %26 : vector<8x32xf32>
    %29 = tpu.reciprocal %28 {approx = true} : vector<8x32xf32> -> vector<8x32xf32>
    %30 = arith.mulf %21, %29 : vector<8x32xf32>
    %31 = arith.truncf %30 : vector<8x32xf32> to vector<8x32xbf16>
    %c0_13 = arith.constant 0 : index
    %c0_14 = arith.constant 0 : index
    %32 = vector.load %arg4[%c0_13, %c0_14] : memref<32x1152xbf16, #tpu.memory_space<vmem>>, vector<32x1152xbf16>
    %cst_15 = arith.constant dense<0.000000e+00> : vector<8x1152xf32>
    %33 = tpu.matmul %31, %32, %cst_15 {dimension_numbers = #tpu.dot_dimension_numbers<[1], [0], [0], [1], [0, 0, 1, 1], [], []>} : vector<8x32xbf16>, vector<32x1152xbf16>, vector<8x1152xf32> -> vector<8x1152xf32>
    %c0_16 = arith.constant 0 : index
    %c0_17 = arith.constant 0 : index
    %34 = vector.load %arg2[%c0_16, %c0_17] : memref<8x32xf32, #tpu.memory_space<vmem>>, vector<8x32xf32>
    %35 = arith.truncf %34 : vector<8x32xf32> to vector<8x32xbf16>
    %c0_18 = arith.constant 0 : index
    %c0_19 = arith.constant 0 : index
    %36 = vector.load %arg5[%c0_18, %c0_19] : memref<32x1184xbf16, #tpu.memory_space<vmem>>, vector<32x1184xbf16>
    %cst_20 = arith.constant dense<0.000000e+00> : vector<8x1184xf32>
    %37 = tpu.matmul %35, %36, %cst_20 {dimension_numbers = #tpu.dot_dimension_numbers<[1], [0], [0], [1], [0, 0, 1, 1], [], []>} : vector<8x32xbf16>, vector<32x1184xbf16>, vector<8x1184xf32> -> vector<8x1184xf32>
    %38 = vector.extract_strided_slice %37 {offsets = [0, 0], sizes = [8, 128], strides = [1, 1]} : vector<8x1184xf32> to vector<8x128xf32>
    %c0_21 = arith.constant 0 : index
    %c0_22 = arith.constant 0 : index
    %39 = vector.load %arg7[%c0_21, %c0_22] : memref<40x128xf32, #tpu.memory_space<vmem>>, vector<1x128xf32>
    %40 = vector.broadcast %39 : vector<1x128xf32> to vector<8x128xf32>
    %41 = arith.addf %38, %40 : vector<8x128xf32>
    %42 = vector.extract_strided_slice %33 {offsets = [0, 0], sizes = [8, 128], strides = [1, 1]} : vector<8x1152xf32> to vector<8x128xf32>
    %c27 = arith.constant 27 : index
    %c0_23 = arith.constant 0 : index
    %43 = vector.load %arg7[%c27, %c0_23] : memref<40x128xf32, #tpu.memory_space<vmem>>, vector<1x128xf32>
    %44 = vector.broadcast %43 : vector<1x128xf32> to vector<8x128xf32>
    %45 = arith.addf %42, %44 : vector<8x128xf32>
    %cst_24 = arith.constant 1.000000e+00 : f32
    %46 = vector.broadcast %cst_24 : f32 to vector<8x128xf32>
    %47 = arith.addf %46, %45 : vector<8x128xf32>
    %48 = arith.mulf %41, %47 : vector<8x128xf32>
    %cst_25 = arith.constant dense<0.000000e+00> : vector<8xf32>
    %49 = vector.multi_reduction <add>, %48, %cst_25 [1] : vector<8x128xf32> to vector<8xf32>
    %50 = vector.shape_cast %49 : vector<8xf32> to vector<8x1xf32>
    %51 = arith.mulf %48, %48 : vector<8x128xf32>
    %cst_26 = arith.constant dense<0.000000e+00> : vector<8xf32>
    %52 = vector.multi_reduction <add>, %51, %cst_26 [1] : vector<8x128xf32> to vector<8xf32>
    %53 = vector.shape_cast %52 : vector<8xf32> to vector<8x1xf32>
    %cst_27 = arith.constant 7.812500e-03 : f32
    %54 = vector.broadcast %cst_27 : f32 to vector<8x1xf32>
    %55 = arith.mulf %50, %54 : vector<8x1xf32>
    %cst_28 = arith.constant 7.812500e-03 : f32
    %56 = vector.broadcast %cst_28 : f32 to vector<8x1xf32>
    %57 = arith.mulf %53, %56 : vector<8x1xf32>
    %58 = arith.mulf %55, %55 : vector<8x1xf32>
    %59 = arith.subf %57, %58 : vector<8x1xf32>
    %60 = vector.broadcast %55 : vector<8x1xf32> to vector<8x128xf32>
    %61 = arith.subf %48, %60 : vector<8x128xf32>
    %cst_29 = arith.constant 9.99999974E-6 : f32
    %62 = vector.broadcast %cst_29 : f32 to vector<8x1xf32>
    %63 = arith.addf %59, %62 : vector<8x1xf32>
    %64 = math.rsqrt %63 : vector<8x1xf32>
    %65 = vector.broadcast %64 : vector<8x1xf32> to vector<8x128xf32>
    %66 = arith.mulf %61, %65 : vector<8x128xf32>
    %c9 = arith.constant 9 : index
    %c0_30 = arith.constant 0 : index
    %67 = vector.load %arg7[%c9, %c0_30] : memref<40x128xf32, #tpu.memory_space<vmem>>, vector<1x128xf32>
    %68 = vector.broadcast %67 : vector<1x128xf32> to vector<8x128xf32>
    %69 = arith.mulf %66, %68 : vector<8x128xf32>
    %c18 = arith.constant 18 : index
    %c0_31 = arith.constant 0 : index
    %70 = vector.load %arg7[%c18, %c0_31] : memref<40x128xf32, #tpu.memory_space<vmem>>, vector<1x128xf32>
    %71 = vector.broadcast %70 : vector<1x128xf32> to vector<8x128xf32>
    %72 = arith.addf %69, %71 : vector<8x128xf32>
    %cst_32 = arith.constant -6.000000e+01 : f32
    %73 = vector.broadcast %cst_32 : f32 to vector<8x128xf32>
    %74 = arith.maximumf %72, %73 : vector<8x128xf32>
    %cst_33 = arith.constant 0.000000e+00 : f32
    %75 = vector.broadcast %cst_33 : f32 to vector<8x128xf32>
    %76 = arith.subf %75, %74 : vector<8x128xf32>
    %77 = math.exp %76 : vector<8x128xf32>
    %cst_34 = arith.constant 1.000000e+00 : f32
    %78 = vector.broadcast %cst_34 : f32 to vector<8x128xf32>
    %79 = arith.addf %78, %77 : vector<8x128xf32>
    %80 = tpu.reciprocal %79 {approx = true} : vector<8x128xf32> -> vector<8x128xf32>
    %81 = arith.mulf %72, %80 : vector<8x128xf32>
    %82 = arith.truncf %81 : vector<8x128xf32> to vector<8x128xbf16>
    %c0_35 = arith.constant 0 : index
    %c0_36 = arith.constant 0 : index
    %c0_37 = arith.constant 0 : index
    %83 = vector.load %arg6[%c0_35, %c0_36, %c0_37] : memref<9x128x128xbf16, #tpu.memory_space<vmem>>, vector<1x128x128xbf16>
    %84 = vector.shape_cast %83 : vector<1x128x128xbf16> to vector<128x128xbf16>
    %cst_38 = arith.constant dense<0.000000e+00> : vector<8x128xf32>
    %85 = tpu.matmul %82, %84, %cst_38 {dimension_numbers = #tpu.dot_dimension_numbers<[1], [0], [0], [1], [0, 0, 1, 1], [], []>} : vector<8x128xbf16>, vector<128x128xbf16>, vector<8x128xf32> -> vector<8x128xf32>
    %86 = vector.extract_strided_slice %37 {offsets = [0, 128], sizes = [8, 128], strides = [1, 1]} : vector<8x1184xf32> to vector<8x128xf32>
    %87 = arith.addf %85, %86 : vector<8x128xf32>
    %c1 = arith.constant 1 : index
    %c0_39 = arith.constant 0 : index
    %88 = vector.load %arg7[%c1, %c0_39] : memref<40x128xf32, #tpu.memory_space<vmem>>, vector<1x128xf32>
    %89 = vector.broadcast %88 : vector<1x128xf32> to vector<8x128xf32>
    %90 = arith.addf %87, %89 : vector<8x128xf32>
    %91 = vector.extract_strided_slice %33 {offsets = [0, 128], sizes = [8, 128], strides = [1, 1]} : vector<8x1152xf32> to vector<8x128xf32>
    %c28 = arith.constant 28 : index
    %c0_40 = arith.constant 0 : index
    %92 = vector.load %arg7[%c28, %c0_40] : memref<40x128xf32, #tpu.memory_space<vmem>>, vector<1x128xf32>
    %93 = vector.broadcast %92 : vector<1x128xf32> to vector<8x128xf32>
    %94 = arith.addf %91, %93 : vector<8x128xf32>
    %cst_41 = arith.constant 1.000000e+00 : f32
    %95 = vector.broadcast %cst_41 : f32 to vector<8x128xf32>
    %96 = arith.addf %95, %94 : vector<8x128xf32>
    %97 = arith.mulf %90, %96 : vector<8x128xf32>
    %cst_42 = arith.constant dense<0.000000e+00> : vector<8xf32>
    %98 = vector.multi_reduction <add>, %97, %cst_42 [1] : vector<8x128xf32> to vector<8xf32>
    %99 = vector.shape_cast %98 : vector<8xf32> to vector<8x1xf32>
    %100 = arith.mulf %97, %97 : vector<8x128xf32>
    %cst_43 = arith.constant dense<0.000000e+00> : vector<8xf32>
    %101 = vector.multi_reduction <add>, %100, %cst_43 [1] : vector<8x128xf32> to vector<8xf32>
    %102 = vector.shape_cast %101 : vector<8xf32> to vector<8x1xf32>
    %cst_44 = arith.constant 7.812500e-03 : f32
    %103 = vector.broadcast %cst_44 : f32 to vector<8x1xf32>
    %104 = arith.mulf %99, %103 : vector<8x1xf32>
    %cst_45 = arith.constant 7.812500e-03 : f32
    %105 = vector.broadcast %cst_45 : f32 to vector<8x1xf32>
    %106 = arith.mulf %102, %105 : vector<8x1xf32>
    %107 = arith.mulf %104, %104 : vector<8x1xf32>
    %108 = arith.subf %106, %107 : vector<8x1xf32>
    %109 = vector.broadcast %104 : vector<8x1xf32> to vector<8x128xf32>
    %110 = arith.subf %97, %109 : vector<8x128xf32>
    %cst_46 = arith.constant 9.99999974E-6 : f32
    %111 = vector.broadcast %cst_46 : f32 to vector<8x1xf32>
    %112 = arith.addf %108, %111 : vector<8x1xf32>
    %113 = math.rsqrt %112 : vector<8x1xf32>
    %114 = vector.broadcast %113 : vector<8x1xf32> to vector<8x128xf32>
    %115 = arith.mulf %110, %114 : vector<8x128xf32>
    %c10 = arith.constant 10 : index
    %c0_47 = arith.constant 0 : index
    %116 = vector.load %arg7[%c10, %c0_47] : memref<40x128xf32, #tpu.memory_space<vmem>>, vector<1x128xf32>
    %117 = vector.broadcast %116 : vector<1x128xf32> to vector<8x128xf32>
    %118 = arith.mulf %115, %117 : vector<8x128xf32>
    %c19 = arith.constant 19 : index
    %c0_48 = arith.constant 0 : index
    %119 = vector.load %arg7[%c19, %c0_48] : memref<40x128xf32, #tpu.memory_space<vmem>>, vector<1x128xf32>
    %120 = vector.broadcast %119 : vector<1x128xf32> to vector<8x128xf32>
    %121 = arith.addf %118, %120 : vector<8x128xf32>
    %cst_49 = arith.constant -6.000000e+01 : f32
    %122 = vector.broadcast %cst_49 : f32 to vector<8x128xf32>
    %123 = arith.maximumf %121, %122 : vector<8x128xf32>
    %cst_50 = arith.constant 0.000000e+00 : f32
    %124 = vector.broadcast %cst_50 : f32 to vector<8x128xf32>
    %125 = arith.subf %124, %123 : vector<8x128xf32>
    %126 = math.exp %125 : vector<8x128xf32>
    %cst_51 = arith.constant 1.000000e+00 : f32
    %127 = vector.broadcast %cst_51 : f32 to vector<8x128xf32>
    %128 = arith.addf %127, %126 : vector<8x128xf32>
    %129 = tpu.reciprocal %128 {approx = true} : vector<8x128xf32> -> vector<8x128xf32>
    %130 = arith.mulf %121, %129 : vector<8x128xf32>
    %131 = arith.truncf %130 : vector<8x128xf32> to vector<8x128xbf16>
    %c1_52 = arith.constant 1 : index
    %c0_53 = arith.constant 0 : index
    %c0_54 = arith.constant 0 : index
    %132 = vector.load %arg6[%c1_52, %c0_53, %c0_54] : memref<9x128x128xbf16, #tpu.memory_space<vmem>>, vector<1x128x128xbf16>
    %133 = vector.shape_cast %132 : vector<1x128x128xbf16> to vector<128x128xbf16>
    %cst_55 = arith.constant dense<0.000000e+00> : vector<8x128xf32>
    %134 = tpu.matmul %131, %133, %cst_55 {dimension_numbers = #tpu.dot_dimension_numbers<[1], [0], [0], [1], [0, 0, 1, 1], [], []>} : vector<8x128xbf16>, vector<128x128xbf16>, vector<8x128xf32> -> vector<8x128xf32>
    %135 = vector.extract_strided_slice %37 {offsets = [0, 256], sizes = [8, 128], strides = [1, 1]} : vector<8x1184xf32> to vector<8x128xf32>
    %136 = arith.addf %134, %135 : vector<8x128xf32>
    %c2 = arith.constant 2 : index
    %c0_56 = arith.constant 0 : index
    %137 = vector.load %arg7[%c2, %c0_56] : memref<40x128xf32, #tpu.memory_space<vmem>>, vector<1x128xf32>
    %138 = vector.broadcast %137 : vector<1x128xf32> to vector<8x128xf32>
    %139 = arith.addf %136, %138 : vector<8x128xf32>
    %140 = vector.extract_strided_slice %33 {offsets = [0, 256], sizes = [8, 128], strides = [1, 1]} : vector<8x1152xf32> to vector<8x128xf32>
    %c29 = arith.constant 29 : index
    %c0_57 = arith.constant 0 : index
    %141 = vector.load %arg7[%c29, %c0_57] : memref<40x128xf32, #tpu.memory_space<vmem>>, vector<1x128xf32>
    %142 = vector.broadcast %141 : vector<1x128xf32> to vector<8x128xf32>
    %143 = arith.addf %140, %142 : vector<8x128xf32>
    %cst_58 = arith.constant 1.000000e+00 : f32
    %144 = vector.broadcast %cst_58 : f32 to vector<8x128xf32>
    %145 = arith.addf %144, %143 : vector<8x128xf32>
    %146 = arith.mulf %139, %145 : vector<8x128xf32>
    %cst_59 = arith.constant dense<0.000000e+00> : vector<8xf32>
    %147 = vector.multi_reduction <add>, %146, %cst_59 [1] : vector<8x128xf32> to vector<8xf32>
    %148 = vector.shape_cast %147 : vector<8xf32> to vector<8x1xf32>
    %149 = arith.mulf %146, %146 : vector<8x128xf32>
    %cst_60 = arith.constant dense<0.000000e+00> : vector<8xf32>
    %150 = vector.multi_reduction <add>, %149, %cst_60 [1] : vector<8x128xf32> to vector<8xf32>
    %151 = vector.shape_cast %150 : vector<8xf32> to vector<8x1xf32>
    %cst_61 = arith.constant 7.812500e-03 : f32
    %152 = vector.broadcast %cst_61 : f32 to vector<8x1xf32>
    %153 = arith.mulf %148, %152 : vector<8x1xf32>
    %cst_62 = arith.constant 7.812500e-03 : f32
    %154 = vector.broadcast %cst_62 : f32 to vector<8x1xf32>
    %155 = arith.mulf %151, %154 : vector<8x1xf32>
    %156 = arith.mulf %153, %153 : vector<8x1xf32>
    %157 = arith.subf %155, %156 : vector<8x1xf32>
    %158 = vector.broadcast %153 : vector<8x1xf32> to vector<8x128xf32>
    %159 = arith.subf %146, %158 : vector<8x128xf32>
    %cst_63 = arith.constant 9.99999974E-6 : f32
    %160 = vector.broadcast %cst_63 : f32 to vector<8x1xf32>
    %161 = arith.addf %157, %160 : vector<8x1xf32>
    %162 = math.rsqrt %161 : vector<8x1xf32>
    %163 = vector.broadcast %162 : vector<8x1xf32> to vector<8x128xf32>
    %164 = arith.mulf %159, %163 : vector<8x128xf32>
    %c11 = arith.constant 11 : index
    %c0_64 = arith.constant 0 : index
    %165 = vector.load %arg7[%c11, %c0_64] : memref<40x128xf32, #tpu.memory_space<vmem>>, vector<1x128xf32>
    %166 = vector.broadcast %165 : vector<1x128xf32> to vector<8x128xf32>
    %167 = arith.mulf %164, %166 : vector<8x128xf32>
    %c20 = arith.constant 20 : index
    %c0_65 = arith.constant 0 : index
    %168 = vector.load %arg7[%c20, %c0_65] : memref<40x128xf32, #tpu.memory_space<vmem>>, vector<1x128xf32>
    %169 = vector.broadcast %168 : vector<1x128xf32> to vector<8x128xf32>
    %170 = arith.addf %167, %169 : vector<8x128xf32>
    %cst_66 = arith.constant -6.000000e+01 : f32
    %171 = vector.broadcast %cst_66 : f32 to vector<8x128xf32>
    %172 = arith.maximumf %170, %171 : vector<8x128xf32>
    %cst_67 = arith.constant 0.000000e+00 : f32
    %173 = vector.broadcast %cst_67 : f32 to vector<8x128xf32>
    %174 = arith.subf %173, %172 : vector<8x128xf32>
    %175 = math.exp %174 : vector<8x128xf32>
    %cst_68 = arith.constant 1.000000e+00 : f32
    %176 = vector.broadcast %cst_68 : f32 to vector<8x128xf32>
    %177 = arith.addf %176, %175 : vector<8x128xf32>
    %178 = tpu.reciprocal %177 {approx = true} : vector<8x128xf32> -> vector<8x128xf32>
    %179 = arith.mulf %170, %178 : vector<8x128xf32>
    %180 = arith.truncf %179 : vector<8x128xf32> to vector<8x128xbf16>
    %c2_69 = arith.constant 2 : index
    %c0_70 = arith.constant 0 : index
    %c0_71 = arith.constant 0 : index
    %181 = vector.load %arg6[%c2_69, %c0_70, %c0_71] : memref<9x128x128xbf16, #tpu.memory_space<vmem>>, vector<1x128x128xbf16>
    %182 = vector.shape_cast %181 : vector<1x128x128xbf16> to vector<128x128xbf16>
    %cst_72 = arith.constant dense<0.000000e+00> : vector<8x128xf32>
    %183 = tpu.matmul %180, %182, %cst_72 {dimension_numbers = #tpu.dot_dimension_numbers<[1], [0], [0], [1], [0, 0, 1, 1], [], []>} : vector<8x128xbf16>, vector<128x128xbf16>, vector<8x128xf32> -> vector<8x128xf32>
    %184 = vector.extract_strided_slice %37 {offsets = [0, 384], sizes = [8, 128], strides = [1, 1]} : vector<8x1184xf32> to vector<8x128xf32>
    %185 = arith.addf %183, %184 : vector<8x128xf32>
    %c3 = arith.constant 3 : index
    %c0_73 = arith.constant 0 : index
    %186 = vector.load %arg7[%c3, %c0_73] : memref<40x128xf32, #tpu.memory_space<vmem>>, vector<1x128xf32>
    %187 = vector.broadcast %186 : vector<1x128xf32> to vector<8x128xf32>
    %188 = arith.addf %185, %187 : vector<8x128xf32>
    %189 = vector.extract_strided_slice %33 {offsets = [0, 384], sizes = [8, 128], strides = [1, 1]} : vector<8x1152xf32> to vector<8x128xf32>
    %c30 = arith.constant 30 : index
    %c0_74 = arith.constant 0 : index
    %190 = vector.load %arg7[%c30, %c0_74] : memref<40x128xf32, #tpu.memory_space<vmem>>, vector<1x128xf32>
    %191 = vector.broadcast %190 : vector<1x128xf32> to vector<8x128xf32>
    %192 = arith.addf %189, %191 : vector<8x128xf32>
    %cst_75 = arith.constant 1.000000e+00 : f32
    %193 = vector.broadcast %cst_75 : f32 to vector<8x128xf32>
    %194 = arith.addf %193, %192 : vector<8x128xf32>
    %195 = arith.mulf %188, %194 : vector<8x128xf32>
    %cst_76 = arith.constant dense<0.000000e+00> : vector<8xf32>
    %196 = vector.multi_reduction <add>, %195, %cst_76 [1] : vector<8x128xf32> to vector<8xf32>
    %197 = vector.shape_cast %196 : vector<8xf32> to vector<8x1xf32>
    %198 = arith.mulf %195, %195 : vector<8x128xf32>
    %cst_77 = arith.constant dense<0.000000e+00> : vector<8xf32>
    %199 = vector.multi_reduction <add>, %198, %cst_77 [1] : vector<8x128xf32> to vector<8xf32>
    %200 = vector.shape_cast %199 : vector<8xf32> to vector<8x1xf32>
    %cst_78 = arith.constant 7.812500e-03 : f32
    %201 = vector.broadcast %cst_78 : f32 to vector<8x1xf32>
    %202 = arith.mulf %197, %201 : vector<8x1xf32>
    %cst_79 = arith.constant 7.812500e-03 : f32
    %203 = vector.broadcast %cst_79 : f32 to vector<8x1xf32>
    %204 = arith.mulf %200, %203 : vector<8x1xf32>
    %205 = arith.mulf %202, %202 : vector<8x1xf32>
    %206 = arith.subf %204, %205 : vector<8x1xf32>
    %207 = vector.broadcast %202 : vector<8x1xf32> to vector<8x128xf32>
    %208 = arith.subf %195, %207 : vector<8x128xf32>
    %cst_80 = arith.constant 9.99999974E-6 : f32
    %209 = vector.broadcast %cst_80 : f32 to vector<8x1xf32>
    %210 = arith.addf %206, %209 : vector<8x1xf32>
    %211 = math.rsqrt %210 : vector<8x1xf32>
    %212 = vector.broadcast %211 : vector<8x1xf32> to vector<8x128xf32>
    %213 = arith.mulf %208, %212 : vector<8x128xf32>
    %c12 = arith.constant 12 : index
    %c0_81 = arith.constant 0 : index
    %214 = vector.load %arg7[%c12, %c0_81] : memref<40x128xf32, #tpu.memory_space<vmem>>, vector<1x128xf32>
    %215 = vector.broadcast %214 : vector<1x128xf32> to vector<8x128xf32>
    %216 = arith.mulf %213, %215 : vector<8x128xf32>
    %c21 = arith.constant 21 : index
    %c0_82 = arith.constant 0 : index
    %217 = vector.load %arg7[%c21, %c0_82] : memref<40x128xf32, #tpu.memory_space<vmem>>, vector<1x128xf32>
    %218 = vector.broadcast %217 : vector<1x128xf32> to vector<8x128xf32>
    %219 = arith.addf %216, %218 : vector<8x128xf32>
    %cst_83 = arith.constant -6.000000e+01 : f32
    %220 = vector.broadcast %cst_83 : f32 to vector<8x128xf32>
    %221 = arith.maximumf %219, %220 : vector<8x128xf32>
    %cst_84 = arith.constant 0.000000e+00 : f32
    %222 = vector.broadcast %cst_84 : f32 to vector<8x128xf32>
    %223 = arith.subf %222, %221 : vector<8x128xf32>
    %224 = math.exp %223 : vector<8x128xf32>
    %cst_85 = arith.constant 1.000000e+00 : f32
    %225 = vector.broadcast %cst_85 : f32 to vector<8x128xf32>
    %226 = arith.addf %225, %224 : vector<8x128xf32>
    %227 = tpu.reciprocal %226 {approx = true} : vector<8x128xf32> -> vector<8x128xf32>
    %228 = arith.mulf %219, %227 : vector<8x128xf32>
    %229 = arith.truncf %228 : vector<8x128xf32> to vector<8x128xbf16>
    %c3_86 = arith.constant 3 : index
    %c0_87 = arith.constant 0 : index
    %c0_88 = arith.constant 0 : index
    %230 = vector.load %arg6[%c3_86, %c0_87, %c0_88] : memref<9x128x128xbf16, #tpu.memory_space<vmem>>, vector<1x128x128xbf16>
    %231 = vector.shape_cast %230 : vector<1x128x128xbf16> to vector<128x128xbf16>
    %cst_89 = arith.constant dense<0.000000e+00> : vector<8x128xf32>
    %232 = tpu.matmul %229, %231, %cst_89 {dimension_numbers = #tpu.dot_dimension_numbers<[1], [0], [0], [1], [0, 0, 1, 1], [], []>} : vector<8x128xbf16>, vector<128x128xbf16>, vector<8x128xf32> -> vector<8x128xf32>
    %233 = vector.extract_strided_slice %37 {offsets = [0, 512], sizes = [8, 128], strides = [1, 1]} : vector<8x1184xf32> to vector<8x128xf32>
    %234 = arith.addf %232, %233 : vector<8x128xf32>
    %c4 = arith.constant 4 : index
    %c0_90 = arith.constant 0 : index
    %235 = vector.load %arg7[%c4, %c0_90] : memref<40x128xf32, #tpu.memory_space<vmem>>, vector<1x128xf32>
    %236 = vector.broadcast %235 : vector<1x128xf32> to vector<8x128xf32>
    %237 = arith.addf %234, %236 : vector<8x128xf32>
    %238 = vector.extract_strided_slice %33 {offsets = [0, 512], sizes = [8, 128], strides = [1, 1]} : vector<8x1152xf32> to vector<8x128xf32>
    %c31 = arith.constant 31 : index
    %c0_91 = arith.constant 0 : index
    %239 = vector.load %arg7[%c31, %c0_91] : memref<40x128xf32, #tpu.memory_space<vmem>>, vector<1x128xf32>
    %240 = vector.broadcast %239 : vector<1x128xf32> to vector<8x128xf32>
    %241 = arith.addf %238, %240 : vector<8x128xf32>
    %cst_92 = arith.constant 1.000000e+00 : f32
    %242 = vector.broadcast %cst_92 : f32 to vector<8x128xf32>
    %243 = arith.addf %242, %241 : vector<8x128xf32>
    %244 = arith.mulf %237, %243 : vector<8x128xf32>
    %cst_93 = arith.constant dense<0.000000e+00> : vector<8xf32>
    %245 = vector.multi_reduction <add>, %244, %cst_93 [1] : vector<8x128xf32> to vector<8xf32>
    %246 = vector.shape_cast %245 : vector<8xf32> to vector<8x1xf32>
    %247 = arith.mulf %244, %244 : vector<8x128xf32>
    %cst_94 = arith.constant dense<0.000000e+00> : vector<8xf32>
    %248 = vector.multi_reduction <add>, %247, %cst_94 [1] : vector<8x128xf32> to vector<8xf32>
    %249 = vector.shape_cast %248 : vector<8xf32> to vector<8x1xf32>
    %cst_95 = arith.constant 7.812500e-03 : f32
    %250 = vector.broadcast %cst_95 : f32 to vector<8x1xf32>
    %251 = arith.mulf %246, %250 : vector<8x1xf32>
    %cst_96 = arith.constant 7.812500e-03 : f32
    %252 = vector.broadcast %cst_96 : f32 to vector<8x1xf32>
    %253 = arith.mulf %249, %252 : vector<8x1xf32>
    %254 = arith.mulf %251, %251 : vector<8x1xf32>
    %255 = arith.subf %253, %254 : vector<8x1xf32>
    %256 = vector.broadcast %251 : vector<8x1xf32> to vector<8x128xf32>
    %257 = arith.subf %244, %256 : vector<8x128xf32>
    %cst_97 = arith.constant 9.99999974E-6 : f32
    %258 = vector.broadcast %cst_97 : f32 to vector<8x1xf32>
    %259 = arith.addf %255, %258 : vector<8x1xf32>
    %260 = math.rsqrt %259 : vector<8x1xf32>
    %261 = vector.broadcast %260 : vector<8x1xf32> to vector<8x128xf32>
    %262 = arith.mulf %257, %261 : vector<8x128xf32>
    %c13 = arith.constant 13 : index
    %c0_98 = arith.constant 0 : index
    %263 = vector.load %arg7[%c13, %c0_98] : memref<40x128xf32, #tpu.memory_space<vmem>>, vector<1x128xf32>
    %264 = vector.broadcast %263 : vector<1x128xf32> to vector<8x128xf32>
    %265 = arith.mulf %262, %264 : vector<8x128xf32>
    %c22 = arith.constant 22 : index
    %c0_99 = arith.constant 0 : index
    %266 = vector.load %arg7[%c22, %c0_99] : memref<40x128xf32, #tpu.memory_space<vmem>>, vector<1x128xf32>
    %267 = vector.broadcast %266 : vector<1x128xf32> to vector<8x128xf32>
    %268 = arith.addf %265, %267 : vector<8x128xf32>
    %cst_100 = arith.constant -6.000000e+01 : f32
    %269 = vector.broadcast %cst_100 : f32 to vector<8x128xf32>
    %270 = arith.maximumf %268, %269 : vector<8x128xf32>
    %cst_101 = arith.constant 0.000000e+00 : f32
    %271 = vector.broadcast %cst_101 : f32 to vector<8x128xf32>
    %272 = arith.subf %271, %270 : vector<8x128xf32>
    %273 = math.exp %272 : vector<8x128xf32>
    %cst_102 = arith.constant 1.000000e+00 : f32
    %274 = vector.broadcast %cst_102 : f32 to vector<8x128xf32>
    %275 = arith.addf %274, %273 : vector<8x128xf32>
    %276 = tpu.reciprocal %275 {approx = true} : vector<8x128xf32> -> vector<8x128xf32>
    %277 = arith.mulf %268, %276 : vector<8x128xf32>
    %278 = arith.truncf %277 : vector<8x128xf32> to vector<8x128xbf16>
    %c4_103 = arith.constant 4 : index
    %c0_104 = arith.constant 0 : index
    %c0_105 = arith.constant 0 : index
    %279 = vector.load %arg6[%c4_103, %c0_104, %c0_105] : memref<9x128x128xbf16, #tpu.memory_space<vmem>>, vector<1x128x128xbf16>
    %280 = vector.shape_cast %279 : vector<1x128x128xbf16> to vector<128x128xbf16>
    %cst_106 = arith.constant dense<0.000000e+00> : vector<8x128xf32>
    %281 = tpu.matmul %278, %280, %cst_106 {dimension_numbers = #tpu.dot_dimension_numbers<[1], [0], [0], [1], [0, 0, 1, 1], [], []>} : vector<8x128xbf16>, vector<128x128xbf16>, vector<8x128xf32> -> vector<8x128xf32>
    %282 = vector.extract_strided_slice %37 {offsets = [0, 640], sizes = [8, 128], strides = [1, 1]} : vector<8x1184xf32> to vector<8x128xf32>
    %283 = arith.addf %281, %282 : vector<8x128xf32>
    %c5 = arith.constant 5 : index
    %c0_107 = arith.constant 0 : index
    %284 = vector.load %arg7[%c5, %c0_107] : memref<40x128xf32, #tpu.memory_space<vmem>>, vector<1x128xf32>
    %285 = vector.broadcast %284 : vector<1x128xf32> to vector<8x128xf32>
    %286 = arith.addf %283, %285 : vector<8x128xf32>
    %287 = vector.extract_strided_slice %33 {offsets = [0, 640], sizes = [8, 128], strides = [1, 1]} : vector<8x1152xf32> to vector<8x128xf32>
    %c32 = arith.constant 32 : index
    %c0_108 = arith.constant 0 : index
    %288 = vector.load %arg7[%c32, %c0_108] : memref<40x128xf32, #tpu.memory_space<vmem>>, vector<1x128xf32>
    %289 = vector.broadcast %288 : vector<1x128xf32> to vector<8x128xf32>
    %290 = arith.addf %287, %289 : vector<8x128xf32>
    %cst_109 = arith.constant 1.000000e+00 : f32
    %291 = vector.broadcast %cst_109 : f32 to vector<8x128xf32>
    %292 = arith.addf %291, %290 : vector<8x128xf32>
    %293 = arith.mulf %286, %292 : vector<8x128xf32>
    %cst_110 = arith.constant dense<0.000000e+00> : vector<8xf32>
    %294 = vector.multi_reduction <add>, %293, %cst_110 [1] : vector<8x128xf32> to vector<8xf32>
    %295 = vector.shape_cast %294 : vector<8xf32> to vector<8x1xf32>
    %296 = arith.mulf %293, %293 : vector<8x128xf32>
    %cst_111 = arith.constant dense<0.000000e+00> : vector<8xf32>
    %297 = vector.multi_reduction <add>, %296, %cst_111 [1] : vector<8x128xf32> to vector<8xf32>
    %298 = vector.shape_cast %297 : vector<8xf32> to vector<8x1xf32>
    %cst_112 = arith.constant 7.812500e-03 : f32
    %299 = vector.broadcast %cst_112 : f32 to vector<8x1xf32>
    %300 = arith.mulf %295, %299 : vector<8x1xf32>
    %cst_113 = arith.constant 7.812500e-03 : f32
    %301 = vector.broadcast %cst_113 : f32 to vector<8x1xf32>
    %302 = arith.mulf %298, %301 : vector<8x1xf32>
    %303 = arith.mulf %300, %300 : vector<8x1xf32>
    %304 = arith.subf %302, %303 : vector<8x1xf32>
    %305 = vector.broadcast %300 : vector<8x1xf32> to vector<8x128xf32>
    %306 = arith.subf %293, %305 : vector<8x128xf32>
    %cst_114 = arith.constant 9.99999974E-6 : f32
    %307 = vector.broadcast %cst_114 : f32 to vector<8x1xf32>
    %308 = arith.addf %304, %307 : vector<8x1xf32>
    %309 = math.rsqrt %308 : vector<8x1xf32>
    %310 = vector.broadcast %309 : vector<8x1xf32> to vector<8x128xf32>
    %311 = arith.mulf %306, %310 : vector<8x128xf32>
    %c14 = arith.constant 14 : index
    %c0_115 = arith.constant 0 : index
    %312 = vector.load %arg7[%c14, %c0_115] : memref<40x128xf32, #tpu.memory_space<vmem>>, vector<1x128xf32>
    %313 = vector.broadcast %312 : vector<1x128xf32> to vector<8x128xf32>
    %314 = arith.mulf %311, %313 : vector<8x128xf32>
    %c23 = arith.constant 23 : index
    %c0_116 = arith.constant 0 : index
    %315 = vector.load %arg7[%c23, %c0_116] : memref<40x128xf32, #tpu.memory_space<vmem>>, vector<1x128xf32>
    %316 = vector.broadcast %315 : vector<1x128xf32> to vector<8x128xf32>
    %317 = arith.addf %314, %316 : vector<8x128xf32>
    %cst_117 = arith.constant -6.000000e+01 : f32
    %318 = vector.broadcast %cst_117 : f32 to vector<8x128xf32>
    %319 = arith.maximumf %317, %318 : vector<8x128xf32>
    %cst_118 = arith.constant 0.000000e+00 : f32
    %320 = vector.broadcast %cst_118 : f32 to vector<8x128xf32>
    %321 = arith.subf %320, %319 : vector<8x128xf32>
    %322 = math.exp %321 : vector<8x128xf32>
    %cst_119 = arith.constant 1.000000e+00 : f32
    %323 = vector.broadcast %cst_119 : f32 to vector<8x128xf32>
    %324 = arith.addf %323, %322 : vector<8x128xf32>
    %325 = tpu.reciprocal %324 {approx = true} : vector<8x128xf32> -> vector<8x128xf32>
    %326 = arith.mulf %317, %325 : vector<8x128xf32>
    %327 = arith.truncf %326 : vector<8x128xf32> to vector<8x128xbf16>
    %c5_120 = arith.constant 5 : index
    %c0_121 = arith.constant 0 : index
    %c0_122 = arith.constant 0 : index
    %328 = vector.load %arg6[%c5_120, %c0_121, %c0_122] : memref<9x128x128xbf16, #tpu.memory_space<vmem>>, vector<1x128x128xbf16>
    %329 = vector.shape_cast %328 : vector<1x128x128xbf16> to vector<128x128xbf16>
    %cst_123 = arith.constant dense<0.000000e+00> : vector<8x128xf32>
    %330 = tpu.matmul %327, %329, %cst_123 {dimension_numbers = #tpu.dot_dimension_numbers<[1], [0], [0], [1], [0, 0, 1, 1], [], []>} : vector<8x128xbf16>, vector<128x128xbf16>, vector<8x128xf32> -> vector<8x128xf32>
    %331 = vector.extract_strided_slice %37 {offsets = [0, 768], sizes = [8, 128], strides = [1, 1]} : vector<8x1184xf32> to vector<8x128xf32>
    %332 = arith.addf %330, %331 : vector<8x128xf32>
    %c6 = arith.constant 6 : index
    %c0_124 = arith.constant 0 : index
    %333 = vector.load %arg7[%c6, %c0_124] : memref<40x128xf32, #tpu.memory_space<vmem>>, vector<1x128xf32>
    %334 = vector.broadcast %333 : vector<1x128xf32> to vector<8x128xf32>
    %335 = arith.addf %332, %334 : vector<8x128xf32>
    %336 = vector.extract_strided_slice %33 {offsets = [0, 768], sizes = [8, 128], strides = [1, 1]} : vector<8x1152xf32> to vector<8x128xf32>
    %c33 = arith.constant 33 : index
    %c0_125 = arith.constant 0 : index
    %337 = vector.load %arg7[%c33, %c0_125] : memref<40x128xf32, #tpu.memory_space<vmem>>, vector<1x128xf32>
    %338 = vector.broadcast %337 : vector<1x128xf32> to vector<8x128xf32>
    %339 = arith.addf %336, %338 : vector<8x128xf32>
    %cst_126 = arith.constant 1.000000e+00 : f32
    %340 = vector.broadcast %cst_126 : f32 to vector<8x128xf32>
    %341 = arith.addf %340, %339 : vector<8x128xf32>
    %342 = arith.mulf %335, %341 : vector<8x128xf32>
    %cst_127 = arith.constant dense<0.000000e+00> : vector<8xf32>
    %343 = vector.multi_reduction <add>, %342, %cst_127 [1] : vector<8x128xf32> to vector<8xf32>
    %344 = vector.shape_cast %343 : vector<8xf32> to vector<8x1xf32>
    %345 = arith.mulf %342, %342 : vector<8x128xf32>
    %cst_128 = arith.constant dense<0.000000e+00> : vector<8xf32>
    %346 = vector.multi_reduction <add>, %345, %cst_128 [1] : vector<8x128xf32> to vector<8xf32>
    %347 = vector.shape_cast %346 : vector<8xf32> to vector<8x1xf32>
    %cst_129 = arith.constant 7.812500e-03 : f32
    %348 = vector.broadcast %cst_129 : f32 to vector<8x1xf32>
    %349 = arith.mulf %344, %348 : vector<8x1xf32>
    %cst_130 = arith.constant 7.812500e-03 : f32
    %350 = vector.broadcast %cst_130 : f32 to vector<8x1xf32>
    %351 = arith.mulf %347, %350 : vector<8x1xf32>
    %352 = arith.mulf %349, %349 : vector<8x1xf32>
    %353 = arith.subf %351, %352 : vector<8x1xf32>
    %354 = vector.broadcast %349 : vector<8x1xf32> to vector<8x128xf32>
    %355 = arith.subf %342, %354 : vector<8x128xf32>
    %cst_131 = arith.constant 9.99999974E-6 : f32
    %356 = vector.broadcast %cst_131 : f32 to vector<8x1xf32>
    %357 = arith.addf %353, %356 : vector<8x1xf32>
    %358 = math.rsqrt %357 : vector<8x1xf32>
    %359 = vector.broadcast %358 : vector<8x1xf32> to vector<8x128xf32>
    %360 = arith.mulf %355, %359 : vector<8x128xf32>
    %c15 = arith.constant 15 : index
    %c0_132 = arith.constant 0 : index
    %361 = vector.load %arg7[%c15, %c0_132] : memref<40x128xf32, #tpu.memory_space<vmem>>, vector<1x128xf32>
    %362 = vector.broadcast %361 : vector<1x128xf32> to vector<8x128xf32>
    %363 = arith.mulf %360, %362 : vector<8x128xf32>
    %c24 = arith.constant 24 : index
    %c0_133 = arith.constant 0 : index
    %364 = vector.load %arg7[%c24, %c0_133] : memref<40x128xf32, #tpu.memory_space<vmem>>, vector<1x128xf32>
    %365 = vector.broadcast %364 : vector<1x128xf32> to vector<8x128xf32>
    %366 = arith.addf %363, %365 : vector<8x128xf32>
    %cst_134 = arith.constant -6.000000e+01 : f32
    %367 = vector.broadcast %cst_134 : f32 to vector<8x128xf32>
    %368 = arith.maximumf %366, %367 : vector<8x128xf32>
    %cst_135 = arith.constant 0.000000e+00 : f32
    %369 = vector.broadcast %cst_135 : f32 to vector<8x128xf32>
    %370 = arith.subf %369, %368 : vector<8x128xf32>
    %371 = math.exp %370 : vector<8x128xf32>
    %cst_136 = arith.constant 1.000000e+00 : f32
    %372 = vector.broadcast %cst_136 : f32 to vector<8x128xf32>
    %373 = arith.addf %372, %371 : vector<8x128xf32>
    %374 = tpu.reciprocal %373 {approx = true} : vector<8x128xf32> -> vector<8x128xf32>
    %375 = arith.mulf %366, %374 : vector<8x128xf32>
    %376 = arith.truncf %375 : vector<8x128xf32> to vector<8x128xbf16>
    %c6_137 = arith.constant 6 : index
    %c0_138 = arith.constant 0 : index
    %c0_139 = arith.constant 0 : index
    %377 = vector.load %arg6[%c6_137, %c0_138, %c0_139] : memref<9x128x128xbf16, #tpu.memory_space<vmem>>, vector<1x128x128xbf16>
    %378 = vector.shape_cast %377 : vector<1x128x128xbf16> to vector<128x128xbf16>
    %cst_140 = arith.constant dense<0.000000e+00> : vector<8x128xf32>
    %379 = tpu.matmul %376, %378, %cst_140 {dimension_numbers = #tpu.dot_dimension_numbers<[1], [0], [0], [1], [0, 0, 1, 1], [], []>} : vector<8x128xbf16>, vector<128x128xbf16>, vector<8x128xf32> -> vector<8x128xf32>
    %380 = vector.extract_strided_slice %37 {offsets = [0, 896], sizes = [8, 128], strides = [1, 1]} : vector<8x1184xf32> to vector<8x128xf32>
    %381 = arith.addf %379, %380 : vector<8x128xf32>
    %c7 = arith.constant 7 : index
    %c0_141 = arith.constant 0 : index
    %382 = vector.load %arg7[%c7, %c0_141] : memref<40x128xf32, #tpu.memory_space<vmem>>, vector<1x128xf32>
    %383 = vector.broadcast %382 : vector<1x128xf32> to vector<8x128xf32>
    %384 = arith.addf %381, %383 : vector<8x128xf32>
    %385 = vector.extract_strided_slice %33 {offsets = [0, 896], sizes = [8, 128], strides = [1, 1]} : vector<8x1152xf32> to vector<8x128xf32>
    %c34 = arith.constant 34 : index
    %c0_142 = arith.constant 0 : index
    %386 = vector.load %arg7[%c34, %c0_142] : memref<40x128xf32, #tpu.memory_space<vmem>>, vector<1x128xf32>
    %387 = vector.broadcast %386 : vector<1x128xf32> to vector<8x128xf32>
    %388 = arith.addf %385, %387 : vector<8x128xf32>
    %cst_143 = arith.constant 1.000000e+00 : f32
    %389 = vector.broadcast %cst_143 : f32 to vector<8x128xf32>
    %390 = arith.addf %389, %388 : vector<8x128xf32>
    %391 = arith.mulf %384, %390 : vector<8x128xf32>
    %cst_144 = arith.constant dense<0.000000e+00> : vector<8xf32>
    %392 = vector.multi_reduction <add>, %391, %cst_144 [1] : vector<8x128xf32> to vector<8xf32>
    %393 = vector.shape_cast %392 : vector<8xf32> to vector<8x1xf32>
    %394 = arith.mulf %391, %391 : vector<8x128xf32>
    %cst_145 = arith.constant dense<0.000000e+00> : vector<8xf32>
    %395 = vector.multi_reduction <add>, %394, %cst_145 [1] : vector<8x128xf32> to vector<8xf32>
    %396 = vector.shape_cast %395 : vector<8xf32> to vector<8x1xf32>
    %cst_146 = arith.constant 7.812500e-03 : f32
    %397 = vector.broadcast %cst_146 : f32 to vector<8x1xf32>
    %398 = arith.mulf %393, %397 : vector<8x1xf32>
    %cst_147 = arith.constant 7.812500e-03 : f32
    %399 = vector.broadcast %cst_147 : f32 to vector<8x1xf32>
    %400 = arith.mulf %396, %399 : vector<8x1xf32>
    %401 = arith.mulf %398, %398 : vector<8x1xf32>
    %402 = arith.subf %400, %401 : vector<8x1xf32>
    %403 = vector.broadcast %398 : vector<8x1xf32> to vector<8x128xf32>
    %404 = arith.subf %391, %403 : vector<8x128xf32>
    %cst_148 = arith.constant 9.99999974E-6 : f32
    %405 = vector.broadcast %cst_148 : f32 to vector<8x1xf32>
    %406 = arith.addf %402, %405 : vector<8x1xf32>
    %407 = math.rsqrt %406 : vector<8x1xf32>
    %408 = vector.broadcast %407 : vector<8x1xf32> to vector<8x128xf32>
    %409 = arith.mulf %404, %408 : vector<8x128xf32>
    %c16 = arith.constant 16 : index
    %c0_149 = arith.constant 0 : index
    %410 = vector.load %arg7[%c16, %c0_149] : memref<40x128xf32, #tpu.memory_space<vmem>>, vector<1x128xf32>
    %411 = vector.broadcast %410 : vector<1x128xf32> to vector<8x128xf32>
    %412 = arith.mulf %409, %411 : vector<8x128xf32>
    %c25 = arith.constant 25 : index
    %c0_150 = arith.constant 0 : index
    %413 = vector.load %arg7[%c25, %c0_150] : memref<40x128xf32, #tpu.memory_space<vmem>>, vector<1x128xf32>
    %414 = vector.broadcast %413 : vector<1x128xf32> to vector<8x128xf32>
    %415 = arith.addf %412, %414 : vector<8x128xf32>
    %cst_151 = arith.constant -6.000000e+01 : f32
    %416 = vector.broadcast %cst_151 : f32 to vector<8x128xf32>
    %417 = arith.maximumf %415, %416 : vector<8x128xf32>
    %cst_152 = arith.constant 0.000000e+00 : f32
    %418 = vector.broadcast %cst_152 : f32 to vector<8x128xf32>
    %419 = arith.subf %418, %417 : vector<8x128xf32>
    %420 = math.exp %419 : vector<8x128xf32>
    %cst_153 = arith.constant 1.000000e+00 : f32
    %421 = vector.broadcast %cst_153 : f32 to vector<8x128xf32>
    %422 = arith.addf %421, %420 : vector<8x128xf32>
    %423 = tpu.reciprocal %422 {approx = true} : vector<8x128xf32> -> vector<8x128xf32>
    %424 = arith.mulf %415, %423 : vector<8x128xf32>
    %425 = arith.truncf %424 : vector<8x128xf32> to vector<8x128xbf16>
    %c7_154 = arith.constant 7 : index
    %c0_155 = arith.constant 0 : index
    %c0_156 = arith.constant 0 : index
    %426 = vector.load %arg6[%c7_154, %c0_155, %c0_156] : memref<9x128x128xbf16, #tpu.memory_space<vmem>>, vector<1x128x128xbf16>
    %427 = vector.shape_cast %426 : vector<1x128x128xbf16> to vector<128x128xbf16>
    %cst_157 = arith.constant dense<0.000000e+00> : vector<8x128xf32>
    %428 = tpu.matmul %425, %427, %cst_157 {dimension_numbers = #tpu.dot_dimension_numbers<[1], [0], [0], [1], [0, 0, 1, 1], [], []>} : vector<8x128xbf16>, vector<128x128xbf16>, vector<8x128xf32> -> vector<8x128xf32>
    %429 = vector.extract_strided_slice %37 {offsets = [0, 1024], sizes = [8, 128], strides = [1, 1]} : vector<8x1184xf32> to vector<8x128xf32>
    %430 = arith.addf %428, %429 : vector<8x128xf32>
    %c8 = arith.constant 8 : index
    %c0_158 = arith.constant 0 : index
    %431 = vector.load %arg7[%c8, %c0_158] : memref<40x128xf32, #tpu.memory_space<vmem>>, vector<1x128xf32>
    %432 = vector.broadcast %431 : vector<1x128xf32> to vector<8x128xf32>
    %433 = arith.addf %430, %432 : vector<8x128xf32>
    %434 = vector.extract_strided_slice %33 {offsets = [0, 1024], sizes = [8, 128], strides = [1, 1]} : vector<8x1152xf32> to vector<8x128xf32>
    %c35 = arith.constant 35 : index
    %c0_159 = arith.constant 0 : index
    %435 = vector.load %arg7[%c35, %c0_159] : memref<40x128xf32, #tpu.memory_space<vmem>>, vector<1x128xf32>
    %436 = vector.broadcast %435 : vector<1x128xf32> to vector<8x128xf32>
    %437 = arith.addf %434, %436 : vector<8x128xf32>
    %cst_160 = arith.constant 1.000000e+00 : f32
    %438 = vector.broadcast %cst_160 : f32 to vector<8x128xf32>
    %439 = arith.addf %438, %437 : vector<8x128xf32>
    %440 = arith.mulf %433, %439 : vector<8x128xf32>
    %cst_161 = arith.constant dense<0.000000e+00> : vector<8xf32>
    %441 = vector.multi_reduction <add>, %440, %cst_161 [1] : vector<8x128xf32> to vector<8xf32>
    %442 = vector.shape_cast %441 : vector<8xf32> to vector<8x1xf32>
    %443 = arith.mulf %440, %440 : vector<8x128xf32>
    %cst_162 = arith.constant dense<0.000000e+00> : vector<8xf32>
    %444 = vector.multi_reduction <add>, %443, %cst_162 [1] : vector<8x128xf32> to vector<8xf32>
    %445 = vector.shape_cast %444 : vector<8xf32> to vector<8x1xf32>
    %cst_163 = arith.constant 7.812500e-03 : f32
    %446 = vector.broadcast %cst_163 : f32 to vector<8x1xf32>
    %447 = arith.mulf %442, %446 : vector<8x1xf32>
    %cst_164 = arith.constant 7.812500e-03 : f32
    %448 = vector.broadcast %cst_164 : f32 to vector<8x1xf32>
    %449 = arith.mulf %445, %448 : vector<8x1xf32>
    %450 = arith.mulf %447, %447 : vector<8x1xf32>
    %451 = arith.subf %449, %450 : vector<8x1xf32>
    %452 = vector.broadcast %447 : vector<8x1xf32> to vector<8x128xf32>
    %453 = arith.subf %440, %452 : vector<8x128xf32>
    %cst_165 = arith.constant 9.99999974E-6 : f32
    %454 = vector.broadcast %cst_165 : f32 to vector<8x1xf32>
    %455 = arith.addf %451, %454 : vector<8x1xf32>
    %456 = math.rsqrt %455 : vector<8x1xf32>
    %457 = vector.broadcast %456 : vector<8x1xf32> to vector<8x128xf32>
    %458 = arith.mulf %453, %457 : vector<8x128xf32>
    %c17 = arith.constant 17 : index
    %c0_166 = arith.constant 0 : index
    %459 = vector.load %arg7[%c17, %c0_166] : memref<40x128xf32, #tpu.memory_space<vmem>>, vector<1x128xf32>
    %460 = vector.broadcast %459 : vector<1x128xf32> to vector<8x128xf32>
    %461 = arith.mulf %458, %460 : vector<8x128xf32>
    %c26 = arith.constant 26 : index
    %c0_167 = arith.constant 0 : index
    %462 = vector.load %arg7[%c26, %c0_167] : memref<40x128xf32, #tpu.memory_space<vmem>>, vector<1x128xf32>
    %463 = vector.broadcast %462 : vector<1x128xf32> to vector<8x128xf32>
    %464 = arith.addf %461, %463 : vector<8x128xf32>
    %cst_168 = arith.constant -6.000000e+01 : f32
    %465 = vector.broadcast %cst_168 : f32 to vector<8x128xf32>
    %466 = arith.maximumf %464, %465 : vector<8x128xf32>
    %cst_169 = arith.constant 0.000000e+00 : f32
    %467 = vector.broadcast %cst_169 : f32 to vector<8x128xf32>
    %468 = arith.subf %467, %466 : vector<8x128xf32>
    %469 = math.exp %468 : vector<8x128xf32>
    %cst_170 = arith.constant 1.000000e+00 : f32
    %470 = vector.broadcast %cst_170 : f32 to vector<8x128xf32>
    %471 = arith.addf %470, %469 : vector<8x128xf32>
    %472 = tpu.reciprocal %471 {approx = true} : vector<8x128xf32> -> vector<8x128xf32>
    %473 = arith.mulf %464, %472 : vector<8x128xf32>
    %474 = arith.truncf %473 : vector<8x128xf32> to vector<8x128xbf16>
    %c8_171 = arith.constant 8 : index
    %c0_172 = arith.constant 0 : index
    %c0_173 = arith.constant 0 : index
    %475 = vector.load %arg6[%c8_171, %c0_172, %c0_173] : memref<9x128x128xbf16, #tpu.memory_space<vmem>>, vector<1x128x128xbf16>
    %476 = vector.shape_cast %475 : vector<1x128x128xbf16> to vector<128x128xbf16>
    %cst_174 = arith.constant dense<0.000000e+00> : vector<8x128xf32>
    %477 = tpu.matmul %474, %476, %cst_174 {dimension_numbers = #tpu.dot_dimension_numbers<[1], [0], [0], [1], [0, 0, 1, 1], [], []>} : vector<8x128xbf16>, vector<128x128xbf16>, vector<8x128xf32> -> vector<8x128xf32>
    %478 = vector.extract_strided_slice %477 {offsets = [0, 0], sizes = [8, 32], strides = [1, 1]} : vector<8x128xf32> to vector<8x32xf32>
    %479 = vector.extract_strided_slice %37 {offsets = [0, 1152], sizes = [8, 32], strides = [1, 1]} : vector<8x1184xf32> to vector<8x32xf32>
    %480 = arith.addf %478, %479 : vector<8x32xf32>
    %c38 = arith.constant 38 : index
    %c0_175 = arith.constant 0 : index
    %481 = vector.load %arg7[%c38, %c0_175] : memref<40x128xf32, #tpu.memory_space<vmem>>, vector<1x32xf32>
    %482 = vector.broadcast %481 : vector<1x32xf32> to vector<8x32xf32>
    %483 = arith.addf %480, %482 : vector<8x32xf32>
    %c0_176 = arith.constant 0 : index
    %c0_177 = arith.constant 0 : index
    %484 = vector.load %arg8[%c0_176, %c0_177] : memref<8x32xf32, #tpu.memory_space<vmem>>, vector<8x32xf32>
    tpu.vector_store %arg8[%c0_176, %c0_177], %483 {strides = array<i32>} : memref<8x32xf32, #tpu.memory_space<vmem>>, vector<8x32xf32>,
    return
  }
  func.func @transform_0(%arg0: i32) -> (i32, i32) {
    %c0_i32 = arith.constant 0 : i32
    %c0_i32_0 = arith.constant 0 : i32
    return %arg0, %c0_i32 : i32, i32
  }
  func.func @transform_1(%arg0: i32) -> (i32, i32) {
    %c0_i32 = arith.constant 0 : i32
    %c0_i32_0 = arith.constant 0 : i32
    return %arg0, %c0_i32 : i32, i32
  }
  func.func @transform_2(%arg0: i32) -> (i32, i32) {
    %c0_i32 = arith.constant 0 : i32
    %c0_i32_0 = arith.constant 0 : i32
    %c0_i32_1 = arith.constant 0 : i32
    return %c0_i32, %c0_i32_0 : i32, i32
  }
  func.func @transform_3(%arg0: i32) -> (i32, i32) {
    %c0_i32 = arith.constant 0 : i32
    %c0_i32_0 = arith.constant 0 : i32
    %c0_i32_1 = arith.constant 0 : i32
    return %c0_i32, %c0_i32_0 : i32, i32
  }
  func.func @transform_4(%arg0: i32) -> (i32, i32) {
    %c0_i32 = arith.constant 0 : i32
    %c0_i32_0 = arith.constant 0 : i32
    %c0_i32_1 = arith.constant 0 : i32
    return %c0_i32, %c0_i32_0 : i32, i32
  }
  func.func @transform_5(%arg0: i32) -> (i32, i32, i32) {
    %c0_i32 = arith.constant 0 : i32
    %c0_i32_0 = arith.constant 0 : i32
    %c0_i32_1 = arith.constant 0 : i32
    %c0_i32_2 = arith.constant 0 : i32
    return %c0_i32, %c0_i32_0, %c0_i32_1 : i32, i32, i32
  }
  func.func @transform_6(%arg0: i32) -> (i32, i32) {
    %c0_i32 = arith.constant 0 : i32
    %c0_i32_0 = arith.constant 0 : i32
    %c0_i32_1 = arith.constant 0 : i32
    return %c0_i32, %c0_i32_0 : i32, i32
  }
  func.func @transform_7(%arg0: i32) -> (i32, i32) {
    %c0_i32 = arith.constant 0 : i32
    %c0_i32_0 = arith.constant 0 : i32
    return %arg0, %c0_i32 : i32, i32
  }
}

</mosaic_0001>

<bundles_post_ra>
// kernel: latent_unet_forward.1
= control target key start
LH: loop header
LB: loop body
LE: loop exit
PB: predicated region body
PF: predicated region fallthrough
CT: control target
= control target key end

     0   :  { %s4075_s0 = inlined_call_operand.vmem [shape: f32[16,64], index: 0, kind: input, shape index: {}]   ;;  %s4076_s1 = inlined_call_operand.vmem [shape: f32[16,32], index: 1, kind: input, shape index: {}]   ;;  %s4077_s2 = inlined_call_operand.vmem [shape: bf16[96,32], index: 2, kind: input, shape index: {}]   ;;  %s4078_s3 = inlined_call_operand.hbm [shape: bf16[32,1152], index: 3, kind: input, shape index: {}]   ;;  %s4079_s4 = inlined_call_operand.vmem [shape: bf16[32,1184], index: 4, kind: input, shape index: {}]   ;;  %s4080_s5 = inlined_call_operand.hbm [shape: bf16[9,128,128], index: 5, kind: input, shape index: {}]   ;;  %s4081_s6 = inlined_call_operand.hbm [shape: f32[40,128], index: 6, kind: input, shape index: {}]   ;;  %s4082_s7 = inlined_call_operand.hbm [shape: f32[16,32], index: 7, kind: output, shape index: {}]  }
   0x1   :  { %4087 = sst [smem:[#allocation14_spill]] %s4080_s5 }
   0x2   :  { %12 = vsyncpa [#allocation3], 0 }
   0x3   :  { %13 = vsyncpa [#allocation6], 0 }
   0x4   :  { %14 = vsyncpa [#allocation4], 0 }
   0x5   :  { %16 = vsyncpa [#allocation4 + $0x1], 0  ;;  %s3608_s24 = smov 0   ;;  %s3610_s25 = smov 0  }
   0x6   :  { %s3612_s26 = smov 0   ;;  %s3614_s27 = smov 0  }
   0x7 LB: > { %4088 = sst [smem:[#allocation12_spill]] %s3549_s26  ;;  %s3629_s28 = sadd.s32 4294967295, %s3553_s27   ;;  %s3553_s27 = sphi %s3614_s27, %s4107_s27   ;;  %s3549_s26 = sphi %s3612_s26, %s4104_s26   ;;  %s3545_s25 = sphi %s3610_s25, %s4106_s25   ;;  %s3541_s24 = sphi %s3608_s24, %s4105_s24  }
   0x8   : > { %s2640_s29 = sadd.s32 4294967294, %s3553_s27   ;;  %s3633_s30 = sadd.s32 1, %s3553_s27  }
   0x9   : > { %s186_s8 = sadd.s32 1, %s3549_s26  ;;  %s183_s9 = ssub.s32 %s3553_s27, %s3633_s30 }
   0xa   : > { %p196_p0 = scmp.ne.s32.totalorder %s3549_s26, %s3545_s25  ;;  %p184_p1 = scmp.eq.s32.totalorder %s183_s9, 0 }
   0xb   : > { %p197_p2 = scmp.eq.s32.totalorder %s3629_s28, 1  ;;  %p202_p3 = scmp.ne.s32.totalorder %s3545_s25, %s3541_s24 }
   0xc   : > { %p203_p4 = scmp.eq.s32.totalorder %s2640_s29, 1  ;;  %p2641_p7 = scmp.ge.s32.totalorder %s3553_s27, 1 }
   0xd   : > { %s3644_s10 = scalar_select %p184_p1, %s3549_s26, %s186_s8  }
   0xe   : > { %p3646_p5 = por %p197_p2, %p196_p0  ;;  %p3650_p6 = por %p203_p4, %p202_p3 }
   0xf   : > { %4089 = sst [smem:[#allocation13_spill]] %s3644_s10  ;;  %p210_p8 = scmp.lt.s32.totalorder %s3553_s27, 3 }
  0x10   : > { %s4090_s11 = scalar_select %p3646_p5, 1, 0 }
  0x11   : > { %s4091_s12 = scalar_select %p3650_p6, 1, 0 }
  0x12   : > { %p4083_p9 = scmp.eq.s32.totalorder %s3629_s28, 0  ;;  %p3657_p10 = pnand %p2641_p7, %p210_p8 }
  0x13   : > { %s3555_s14 = smov [#allocation5]   ;;  %s3556_s17 = smov [#allocation2]  }
  0x14   : > { %s4092_s13 = scalar_select %p3657_p10, 1, 0 }
  0x15   : > { %s241_s15 = sshll.u32 %s3555_s14, 4  ;;  %p3138_p11 = pneg %p3657_p10  ;;  %s242_s15 = int_to_ptr.vmem [resolvable:$true] %s241_s15 }
  0x16   : > { %s225_s18 = sshll.u32 %s3556_s17, 4  ;;  %s4094_s5 = sld [smem:[#allocation14_spill]]  ;;  %s3669_s18 = int_to_ptr.vmem [resolvable:$true] %s225_s18 }
  0x17   : > { %p3665_p12 = pnand %p4083_p9, %p3138_p11 }
  0x19   : > { %p3679_p0 = pneg %p3665_p12 }
  0x1c   : > { %s3399_s21 = scalar_lea.hbm %s4094_s5, 9216 }
  0x1d   : > { %p3400_p13 = scmp.ne.s32.totalorder %s4094_s5, %s3399_s21  ;;  %p3406_p3 = scmp.lt.u32.totalorder %s3399_s21, %s4094_s5 }
  0x1f   : > { %p3402_p1 = pnand %p3679_p0, %p3400_p13 }
  0x21   : > { %p3403_p2 = pneg %p3402_p1 }
  0x23   : > { %p3408_p4 = pnand %p3406_p3, %p3403_p2 }
  0x25   : > { %3411 = shalt.err (!%p3408_p4)
}
  0x26   : > { %s3412_s14 = scalar_lea.vmem %s242_s15, 9216  ;;  %p3420_p9 = scmp.lt.s32.totalorder %s242_s15, %s242_s15 }
  0x27   : > { %p3413_p7 = scmp.ne.s32.totalorder %s242_s15, %s3412_s14  ;;  %p3421_p6 = scmp.lt.s32.totalorder %s3412_s14, %s3412_s14 }
  0x29   : > { %p3415_p8 = pnand %p3413_p7, %p3679_p0  ;;  %p3422_p5 = por %p3421_p6, %p3420_p9 }
  0x2b   : > { %p3416_p11 = pneg %p3415_p8 }
  0x2d   : > { %p3423_p10 = pnand %p3422_p5, %p3416_p11 }
  0x2f   : > { %3426 = shalt.err (!%p3423_p10)
}
  0x30   : > { %s3557_s17 = smov 64   ;;  %s3558_s19 = smov 4  }
  0x31   : > { %3144 = dma.hbm_to_vmem [thread:$0]  (!%p3665_p12), %s4094_s5, 9216, %s242_s15, [#allocation6], %s3557_s17, %s3557_s17, %s3558_s19  }
  0x32   : > { %s3427_s8 = scalar_lea.hbm %s4078_s3, 2304 }
  0x33   : > { %p3428_p13 = scmp.ne.s32.totalorder %s4078_s3, %s3427_s8  ;;  %p3434_p9 = scmp.lt.u32.totalorder %s3427_s8, %s4078_s3 }
  0x35   : > { %p3430_p5 = pnand %p3428_p13, %p3679_p0 }
  0x37   : > { %p3431_p6 = pneg %p3430_p5 }
  0x39   : > { %p3436_p10 = pnand %p3434_p9, %p3431_p6 }
  0x3b   : > { %3439 = shalt.err (!%p3436_p10)
}
  0x3c   : > { %s3440_s15 = scalar_lea.vmem %s3669_s18, 2304  ;;  %p3448_p4 = scmp.lt.s32.totalorder %s3669_s18, %s3669_s18 }
  0x3d   : > { %p3441_p1 = scmp.ne.s32.totalorder %s3669_s18, %s3440_s15  ;;  %p3449_p7 = scmp.lt.s32.totalorder %s3440_s15, %s3440_s15 }
  0x3f   : > { %p3443_p2 = pnand %p3441_p1, %p3679_p0  ;;  %p3450_p8 = por %p3449_p7, %p3448_p4 }
  0x41   : > { %p3444_p3 = pneg %p3443_p2 }
  0x43   : > { %p3451_p11 = pnand %p3450_p8, %p3444_p3 }
  0x45   : > { %3454 = shalt.err (!%p3451_p11)
}
  0x46   : > { %s3559_s10 = smov 576   ;;  %s3560_s26 = smov 36  }
  0x47   : > { %3141 = dma.hbm_to_vmem [thread:$0]  (!%p3665_p12), %s4078_s3, 2304, %s3669_s18, [#allocation3], %s3559_s10, %s3559_s10, %s3560_s26  }
  0x48   : > { %s3561_s20 = smov [#allocation7]   ;;  %s3455_s8 = scalar_lea.hbm %s4081_s6, 640 }
  0x49   : > { %s254_s21 = sshll.u32 %s3561_s20, 4  ;;  %p3456_p13 = scmp.ne.s32.totalorder %s4081_s6, %s3455_s8  ;;  %s255_s21 = int_to_ptr.vmem [resolvable:$true] %s254_s21 }
  0x4a   : > { %p3462_p9 = scmp.lt.u32.totalorder %s3455_s8, %s4081_s6 }
  0x4b   : > { %p3458_p5 = pnand %p3456_p13, %p3679_p0 }
  0x4d   : > { %p3459_p6 = pneg %p3458_p5 }
  0x4f   : > { %p3464_p10 = pnand %p3462_p9, %p3459_p6 }
  0x51   : > { %3467 = shalt.err (!%p3464_p10)
}
  0x52   : > { %s3468_s18 = scalar_lea.vmem %s255_s21, 640  ;;  %p3476_p4 = scmp.lt.s32.totalorder %s255_s21, %s255_s21 }
  0x53   : > { %p3469_p1 = scmp.ne.s32.totalorder %s255_s21, %s3468_s18  ;;  %p3477_p7 = scmp.lt.s32.totalorder %s3468_s18, %s3468_s18 }
  0x55   : > { %p3471_p2 = pnand %p3469_p1, %p3679_p0  ;;  %p3478_p8 = por %p3477_p7, %p3476_p4 }
  0x57   : > { %p3472_p3 = pneg %p3471_p2 }
  0x59   : > { %p3479_p11 = pnand %p3478_p8, %p3472_p3 }
  0x5b   : > { %3482 = shalt.err (!%p3479_p11)
}
  0x5c   : > { %s3562_s10 = smov 128   ;;  %s3563_s26 = smov 8  }
  0x5d   : > { %3147 = dma.hbm_to_vmem [thread:$0]  (!%p3665_p12), %s4081_s6, 640, %s255_s21, [#allocation6], %s3562_s10, %s3562_s10, %s3563_s26  }
  0x5e   : > { %p4096_p13 = scmp.ne.s32.totalorder %s4092_s13, 0 }
  0x5f   : > { %p4097_p5 = scmp.eq.s32.totalorder (!%p4096_p13), %s3629_s28, 0 }
  0x60   : > { %284 = sbr.rel (%p4096_p13) target bundleno = 4640 (0x1220), region = 48 }
  0x67   : > { %3528 = dma.done.wait (%p4097_p5), [#allocation3], 2304   ;;  %p4098_p0 = pmov %p4097_p5 }
  0x69   : > { %3530 = vsyncadd (%p4098_p0), [#allocation3], 4294964992  ;;  %p4099_p6 = pmov %p4098_p0 }
  0x6a   : > { %p4100_p9 = pmov %p4098_p0 }
  0x6b   : > { %3532 = dma.done.wait (%p4099_p6), [#allocation6], 9856  }
  0x6c   : > { %3534 = vsyncadd (%p4100_p9), [#allocation6], 4294957440  ;;  %v3564_v0 = vmov 0.0   ;;  %vm3565_vm0 = vmmov 0   ;;  %p327_p12 = scmp.lt.s32.totalorder %s3629_s28, 1  ;;  %v3203_v1 = vld [vmem:[%s4077_s2] sm:$0xff]  }
  0x6d   : > { %2916 = vmatprep.subr.bf16.mxu0 %v3564_v0  ;;  %2924 = vmatprep.mubr.msk.bf16.mxu0 %vm3565_vm0, %v3564_v0  ;;  %v3204_v2 = vld [vmem:[%s4077_s2 + $0x8] sm:$0xff]   ;;  %v3205_v3 = vld [vmem:[%s4077_s2 + $0x10] sm:$0xff]   ;;  %v3206_v4 = vld [vmem:[%s4077_s2 + $0x18] sm:$0xff]   ;;  %vm376_vm1 = vcmask 523264   ;;  %vm448_vm2 = vcmask 261120   ;;  %v3566_v32 = vmov 0  }
  0x6e   : > { %s3751_s13 = scalar_select %p327_p12, %s3629_s28, 1  ;;  %2917 = vmatpush3.bf16.msra.mxu0 %v3203_v1  ;;  %v3207_v7 = vld [vmem:[%s4077_s2 + $0x20] sm:$0xff]   ;;  %v3208_v8 = vld [vmem:[%s4077_s2 + $0x28] sm:$0xff]   ;;  %v2653_v9 = vld [vmem:[#allocation7 + $0x24] ss:$0 sm:$0xff]  ;;  %647 = vmatprep.mubr.bf16.mxu1 %v3566_v32 }
  0x6f   : > { %2918 = vmatprep.subr.bf16.mxu0 %v3564_v0  ;;  %v3211_v23 = vld [vmem:[#allocation2 + $0xc] ss:$36 sps:$4 sm:$0xff]   ;;  %v3212_v24 = vld [vmem:[#allocation2 + $0x4] ss:$36 sps:$4 sm:$0xff]   ;;  %v3217_v27 = vld [vmem:[#allocation2 + $0x54] ss:$36 sps:$4 sm:$0xff]  }
  0x70   : > { %s2651_s21 = sshll.u32 %s3751_s13, 3  ;;  %v3209_v25 = vld [vmem:[#allocation2 + $0x8] ss:$36 sps:$4 sm:$0xff]   ;;  %v3214_v26 = vld [vmem:[#allocation2] ss:$36 sps:$4 sm:$0xff]   ;;  %615 = vmatprep.subr.bf16.mxu1 %v3212_v24  ;;  %s324_s15 = sand.u32 1, %s3545_s25  }
  0x71   : > { %s330_s14 = scalar_lea.vmem %s4075_s0, %s2651_s21  ;;  %616 = vmatpush1.bf16.msra.mxu1 %v3214_v26  ;;  %v3218_v28 = vld [vmem:[#allocation2 + $0x4c] ss:$36 sps:$4 sm:$0xff]   ;;  %v3223_v31 = vld [vmem:[#allocation2 + $0x1c] ss:$36 sps:$4 sm:$0xff]   ;;  %v3226_v33 = vld [vmem:[#allocation2 + $0x14] ss:$36 sps:$4 sm:$0xff]   ;;  %s334_s8 = scalar_lea.vmem %s4076_s1, %s2651_s21 }
  0x72   : > { %2919 = vmatpush3.bf16.msra.mxu0 %v3204_v2  ;;  %v338_v5 = vld [vmem:[%s330_s14] sm:$0xff]  ;;  %v3215_v29 = vld [vmem:[#allocation2 + $0x50] ss:$36 sps:$4 sm:$0xff]   ;;  %v3220_v30 = vld [vmem:[#allocation2 + $0x48] ss:$36 sps:$4 sm:$0xff]   ;;  %617 = vmatprep.subr.bf16.mxu1 %v3218_v28  ;;  %s2650_s13 = sshll.u32 %s324_s15, 3 }
  0x73   : > { %2920 = vmatprep.subr.bf16.mxu0 %v3564_v0  ;;  %v339_v6 = vpack.c.bf16 %v338_v5, %v338_v5  ;;  %v2659_v34 = vld [vmem:[#allocation7 + $0x25] ss:$0 sm:$0xff]  ;;  %v3221_v47 = vld [vmem:[#allocation2 + $0x18] ss:$36 sps:$4 sm:$0xff]   ;;  %v3229_v50 = vld [vmem:[#allocation2 + $0x64] ss:$36 sps:$4 sm:$0xff]  }
  0x74   : > { %v3224_v48 = vld [vmem:[#allocation2 + $0x10] ss:$36 sps:$4 sm:$0xff]   ;;  %v3232_v51 = vld [vmem:[#allocation2 + $0x5c] ss:$36 sps:$4 sm:$0xff]   ;;  %v3235_v54 = vld [vmem:[%s4079_s4 + $0x4] ss:$40 sps:$4 sm:$0xff]  }
  0x75   : > { %618 = vmatpush1.bf16.msra.mxu1 %v3220_v30  ;;  %v3227_v52 = vld [vmem:[#allocation2 + $0x60] ss:$36 sps:$4 sm:$0xff]   ;;  %v3230_v53 = vld [vmem:[#allocation2 + $0x58] ss:$36 sps:$4 sm:$0xff]   ;;  %v3240_v60 = vld [vmem:[#allocation2 + $0x68] ss:$36 sps:$4 sm:$0xff]  }
  0x76   : > { %2921 = vmatpush3.bf16.msra.mxu0 %v3205_v3  ;;  %697 = vmatprep.subr.bf16.mxu1 %v3226_v33  ;;  %v3233_v55 = vld [vmem:[%s4079_s4] ss:$40 sps:$4 sm:$0xff]   ;;  %v3239_v57 = vld [vmem:[%s4079_s4 + $0x54] ss:$40 sps:$4 sm:$0xff]   ;;  %v3237_v59 = vld [vmem:[%s4079_s4 + $0x50] ss:$40 sps:$4 sm:$0xff]  }
  0x77   : > { %2922 = vmatprep.subr.bf16.mxu0 %v3564_v0  ;;  %v3236_v56 = vld [vmem:[#allocation2 + $0x20] ss:$36 sps:$4 sm:$0xff]   ;;  %v3243_v30 = vld [vmem:[%s4079_s4 + $0xc] ss:$40 sps:$4 sm:$0xff]   ;;  %s2821_s21 = sshll.u32 %s3629_s28, 7  ;;  %s326_s18 = scalar_lea.vmem [#allocation8], %s2650_s13 }
  0x78   : > { %v819_v58 = vld [vmem:[%s334_s8] sm:$0xff]  ;;  %s2538_s10 = sshll.u32 %s326_s18, 4  ;;  %s4032_s5 = scalar_lea.hbm %s4082_s7, %s2821_s21  ;;  %s4034_s10 = int_to_ptr.vmem [resolvable:$true] %s2538_s10 }
  0x79   : > { %v3815_v61 = vpack.c.bf16 %v819_v58, %v819_v58  ;;  %v3246_v33 = vld [vmem:[%s4079_s4 + $0x5c] ss:$40 sps:$4 sm:$0xff]   ;;  %v2714_v58 = vld [vmem:[#allocation7 + $0x12] ss:$0 sm:$0xff]  ;;  %s2525_s28 = scalar_lea.sflag [#allocation4], %s324_s15  ;;  %s3483_s16 = scalar_lea.vmem %s4034_s10, 128 }
  0x7a   : > { %2923 = vmatpush3.bf16.msra.mxu0 %v3206_v4  ;;  %p3484_p10 = scmp.ne.s32.totalorder %s4034_s10, %s3483_s16  ;;  %p4101_p1 = scmp.ne.s32.totalorder %s4090_s11, 0 }
  0x7b   : > { %2928 = vmatprep.subr.bf16.mxu0 %v3564_v0  ;;  %s3567_s29 = smov [#allocation8]  }
  0x7c   : > { %p3485_p2 = pnand %p3484_p10, %p4101_p1  ;;  %s3487_s19 = sshll.u32 %s3567_s29, 4  ;;  %s3488_s19 = int_to_ptr.vmem [resolvable:$false] %s3487_s19 }
  0x7d   : > { %2925 = vmatmul.mubr.msk.bf16.vlgmr.msra.gmra.mrb[0].mxu0 %vm376_vm1, %v339_v6  ;;  %s3489_s20 = scalar_lea.vmem %s3488_s19, 256  ;;  %p3490_p4 = scmp.lt.s32.totalorder %s4034_s10, %s3488_s19 }
  0x7e   : > { %2932 = vmatprep.mubr.msk.bf16.mxu0 %vm3565_vm0, %v3564_v0  ;;  %2929 = vmatpush3.bf16.msra.mxu0 %v3207_v7  ;;  %p3486_p3 = pneg %p3485_p2  ;;  %p3491_p7 = scmp.lt.s32.totalorder %s3489_s20, %s3483_s16 }
  0x7f   : > { %2930 = vmatprep.subr.bf16.mxu0 %v3564_v0 }
  0x80   : > { %p3492_p8 = por %p3491_p7, %p3490_p4 }
  0x82   : > { %2931 = vmatpush3.bf16.msra.mxu0 %v3208_v8  ;;  %p3493_p11 = pnand %p3492_p8, %p3486_p3 }
  0x83   : > { %656 = vmatprep.subr.bf16.mxu0 %v3211_v23 }
 0x150   : > { %v414_v10 = vpop.f32.mrb[0].mxu0 }
 0x151   : > { %v415_v11 = vadd.f32 %v2653_v9, %v414_v10  ;;  %v2926_v12 = vpop.f32.mrb[1].mxu0 }
 0x152   : > { %v417_v13 = vpop.f32.mrb[2].mxu0 }
 0x153   : > { %v420_v14 = vmax.f32 %v415_v11, -60.0  ;;  %v2927_v15 = vpop.f32.mrb[3].mxu0 }
 0x155   : > { %v421_v16 = vsub.f32 0.0, %v420_v14 }
 0x157   : > { %v422_v17 = vmul.f32 1.442695, %v421_v16 }
 0x159   : > { %3337 = vpow2.f32 %v422_v17  ;;  %v2711_v17 = vld [vmem:[#allocation7] ss:$0 sm:$0xff] }
 0x163   : > { %v3338_v18 = vpop.eup %3337 }
 0x164   : > { %v424_v19 = vadd.f32 1.0, %v3338_v18 }
 0x166   : > { %3339 = vrcp.f32 %v424_v19 }
 0x170   : > { %v3340_v20 = vpop.eup %3339 }
 0x171   : > { %v426_v21 = vmul.f32 %v3340_v20, %v415_v11  ;;  %v2712_v11 = vld [vmem:[#allocation7 + $0x1b] ss:$0 sm:$0xff] }
 0x173   : > { %v427_v22 = vpack.c.bf16 %v426_v21, %v426_v21 }
 0x175   : > { %2933 = vmatmul.mubr.msk.bf16.vlgmr.msra.gmra.mrb[4].mxu0 %vm448_vm2, %v427_v22 }
 0x176   : > { %657 = vmatpush1.bf16.msra.mxu0 %v3209_v25  ;;  %688 = vmatprep.mubr.bf16.mxu0 %v3566_v32 }
 0x177   : > { %658 = vmatprep.subr.bf16.mxu0 %v3217_v27 }
 0x17a   : > { %659 = vmatpush1.bf16.msra.mxu0 %v3215_v29 }
 0x17b   : > { %738 = vmatprep.subr.bf16.mxu0 %v3223_v31  ;;  %v3241_v31 = vld [vmem:[%s4079_s4 + $0x8] ss:$40 sps:$4 sm:$0xff]  }
 0x248   : > { %v486_v35 = vpop.f32.mrb[4].mxu0 }
 0x249   : > { %v487_v36 = vadd.f32 %v2659_v34, %v486_v35  ;;  %v2934_v37 = vpop.f32.mrb[5].mxu0  ;;  %v3244_v34 = vld [vmem:[%s4079_s4 + $0x58] ss:$40 sps:$4 sm:$0xff]   ;;  %v3249_v35 = vld [vmem:[%s4079_s4 + $0x1c] ss:$40 sps:$4 sm:$0xff]  }
 0x24a   : > { %v489_v38 = vpop.f32.mrb[6].mxu0  ;;  %v3252_v37 = vld [vmem:[%s4079_s4 + $0x6c] ss:$40 sps:$4 sm:$0xff]  }
 0x24b   : > { %v492_v39 = vmax.f32 %v487_v36, -60.0  ;;  %v2935_v40 = vpop.f32.mrb[7].mxu0  ;;  %v3250_v38 = vld [vmem:[%s4079_s4 + $0x68] ss:$40 sps:$4 sm:$0xff]  }
 0x24c   : > { %v3254_v40 = vld [vmem:[#allocation5 + $0x8] sm:$0xff]  }
 0x24d   : > { %v493_v41 = vsub.f32 0.0, %v492_v39  ;;  %v3253_v39 = vld [vmem:[#allocation5] sm:$0xff]  }
 0x24f   : > { %v494_v42 = vmul.f32 1.442695, %v493_v41  ;;  %v3255_v41 = vld [vmem:[#allocation5 + $0x10] sm:$0xff]  }
 0x251   : > { %3341 = vpow2.f32 %v494_v42  ;;  %v3256_v42 = vld [vmem:[#allocation5 + $0x18] sm:$0xff]  }
 0x25b   : > { %v3342_v43 = vpop.eup %3341 }
 0x25c   : > { %v496_v44 = vadd.f32 1.0, %v3342_v43  ;;  %v3257_v43 = vld [vmem:[#allocation5 + $0x20] sm:$0xff]  }
 0x25e   : > { %3343 = vrcp.f32 %v496_v44  ;;  %v3258_v44 = vld [vmem:[#allocation5 + $0x28] sm:$0xff]  }
 0x268   : > { %v3344_v45 = vpop.eup %3343 }
 0x269   : > { %v498_v46 = vmul.f32 %v3344_v45, %v487_v36  ;;  %v3247_v36 = vld [vmem:[%s4079_s4 + $0x18] ss:$40 sps:$4 sm:$0xff]  }
 0x26a   : > { %v3259_v45 = vld [vmem:[#allocation5 + $0x30] sm:$0xff]  }
 0x26b   : > { %v499_v49 = vpack.c.bf16 %v498_v46, %v498_v46  ;;  %v3260_v46 = vld [vmem:[#allocation5 + $0x38] sm:$0xff]  }
 0x26d   : > { %2681 = vmatmul.mubr.msk.bf16.vlgmr.msra.gmra.mrb[0].mxu1 %vm448_vm2, %v499_v49  ;;  %2682 = vmatmul.mubr.msk.bf16.vlgmr.msra.gmra.mrb[8].mxu0 %vm448_vm2, %v499_v49 }
 0x26e   : > { %739 = vmatpush1.bf16.msra.mxu0 %v3221_v47  ;;  %698 = vmatpush1.bf16.msra.mxu1 %v3224_v48 }
 0x26f   : > { %740 = vmatprep.subr.bf16.mxu0 %v3229_v50  ;;  %699 = vmatprep.subr.bf16.mxu1 %v3232_v51 }
 0x270   : > { %729 = vmatprep.mubr.bf16.mxu1 %v3566_v32  ;;  %770 = vmatprep.mubr.bf16.mxu0 %v3566_v32 }
 0x272   : > { %741 = vmatpush1.bf16.msra.mxu0 %v3227_v52  ;;  %700 = vmatpush1.bf16.msra.mxu1 %v3230_v53 }
 0x273   : > { %944 = vmatprep.subr.bf16.mxu0 %v3235_v54  ;;  %2936 = vmatprep.subr.bf16.mxu1 %v3564_v0 }
 0x275   : > { %2683 = vmatmul.mubr.msk.bf16.vlgmr.msra.gmra.mrb[4].mxu1 %vm448_vm2, %v499_v49  ;;  %2684 = vmatmul.mubr.msk.bf16.vlgmr.msra.gmra.mrb[12].mxu0 %vm448_vm2, %v499_v49 }
 0x276   : > { %945 = vmatpush1.bf16.msra.mxu0 %v3233_v55  ;;  %2937 = vmatpush3.bf16.msra.mxu1 %v3236_v56  ;;  %v2713_v56 = vld [vmem:[#allocation7 + $0x9] ss:$0 sm:$0xff] }
 0x277   : > { %946 = vmatprep.subr.bf16.mxu0 %v3239_v57  ;;  %2938 = vmatprep.subr.bf16.mxu1 %v3564_v0 }
 0x278   : > { %2940 = vmatprep.mubr.msk.bf16.mxu1 %vm3565_vm0, %v3564_v0  ;;  %976 = vmatprep.mubr.bf16.mxu0 %v3566_v32 }
 0x27a   : > { %947 = vmatpush1.bf16.msra.mxu0 %v3237_v59  ;;  %2939 = vmatpush3.bf16.msra.mxu1 %v3240_v60 }
 0x27b   : > { %985 = vmatprep.subr.bf16.mxu1 %v3243_v30 }
 0x27d   : > { %2941 = vmatmul.mubr.msk.bf16.vlgmr.msra.gmra.mrb[8].mxu1 %vm448_vm2, %v499_v49  ;;  %2706 = vmatmul.mubr.msk.bf16.vlgmr.msra.gmra.mrb[16].mxu0 %vm448_vm2, %v3815_v61 }
 0x27e   : > { %1017 = vmatprep.mubr.bf16.mxu1 %v3566_v32  ;;  %1058 = vmatprep.mubr.bf16.mxu0 %v3566_v32 }
 0x27f   : > { %986 = vmatpush1.bf16.msra.mxu1 %v3241_v31 }
 0x280   : > { %987 = vmatprep.subr.bf16.mxu1 %v3246_v33 }
 0x283   : > { %988 = vmatpush1.bf16.msra.mxu1 %v3244_v34 }
 0x284   : > { %1067 = vmatprep.subr.bf16.mxu1 %v3249_v35 }
 0x286   : > { %2707 = vmatmul.mubr.msk.bf16.vlgmr.msra.gmra.mrb[12].mxu1 %vm448_vm2, %v3815_v61 }
 0x287   : > { %1068 = vmatpush1.bf16.msra.mxu1 %v3247_v36  ;;  %1099 = vmatprep.mubr.bf16.mxu1 %v3566_v32 }
 0x288   : > { %1069 = vmatprep.subr.bf16.mxu1 %v3252_v37  ;;  %v3263_v37 = vld [vmem:[%s4079_s4 + $0x14] ss:$40 sps:$4 sm:$0xff]  }
 0x289   : > { %1026 = vmatprep.subr.bf16.mxu0 %v3263_v37 }
 0x28b   : > { %1070 = vmatpush1.bf16.msra.mxu1 %v3250_v38  ;;  %v3264_v38 = vld [vmem:[%s4079_s4 + $0x60] ss:$40 sps:$4 sm:$0xff]  }
 0x28c   : > { %2944 = vmatprep.subr.bf16.mxu1 %v3564_v0 }
 0x28e   : > { %2709 = vmatmul.mubr.msk.bf16.vlgmr.msra.gmra.mrb[16].mxu1 %vm448_vm2, %v3815_v61 }
 0x28f   : > { %2945 = vmatpush3.bf16.msra.mxu1 %v3253_v39  ;;  %2960 = vmatprep.mubr.msk.bf16.mxu1 %vm3565_vm0, %v3564_v0  ;;  %v3269_v39 = vld [vmem:[%s4079_s4 + $0x24] ss:$40 sps:$4 sm:$0xff]  }
 0x290   : > { %2946 = vmatprep.subr.bf16.mxu1 %v3564_v0 }
 0x293   : > { %2947 = vmatpush3.bf16.msra.mxu1 %v3254_v40  ;;  %v3267_v40 = vld [vmem:[%s4079_s4 + $0x20] ss:$40 sps:$4 sm:$0xff]  }
 0x294   : > { %2948 = vmatprep.subr.bf16.mxu1 %v3564_v0 }
 0x297   : > { %2949 = vmatpush3.bf16.msra.mxu1 %v3255_v41  ;;  %v3272_v41 = vld [vmem:[%s4079_s4 + $0x74] ss:$40 sps:$4 sm:$0xff]  }
 0x298   : > { %2950 = vmatprep.subr.bf16.mxu1 %v3564_v0 }
 0x29b   : > { %2951 = vmatpush3.bf16.msra.mxu1 %v3256_v42  ;;  %v3270_v42 = vld [vmem:[%s4079_s4 + $0x70] ss:$40 sps:$4 sm:$0xff]  }
 0x29c   : > { %2952 = vmatprep.subr.bf16.mxu1 %v3564_v0 }
 0x29f   : > { %2953 = vmatpush3.bf16.msra.mxu1 %v3257_v43  ;;  %v3273_v43 = vld [vmem:[#allocation5 + $0x40] sm:$0xff]  }
 0x2a0   : > { %2954 = vmatprep.subr.bf16.mxu1 %v3564_v0 }
 0x2a3   : > { %2955 = vmatpush3.bf16.msra.mxu1 %v3258_v44  ;;  %v3274_v44 = vld [vmem:[#allocation5 + $0x48] sm:$0xff]  }
 0x2a4   : > { %2956 = vmatprep.subr.bf16.mxu1 %v3564_v0 }
 0x2a7   : > { %2957 = vmatpush3.bf16.msra.mxu1 %v3259_v45  ;;  %v3275_v45 = vld [vmem:[#allocation5 + $0x50] sm:$0xff]  }
 0x2a8   : > { %2958 = vmatprep.subr.bf16.mxu1 %v3564_v0 }
 0x2ab   : > { %2959 = vmatpush3.bf16.msra.mxu1 %v3260_v46  ;;  %v3277_v46 = vld [vmem:[#allocation5 + $0x60] sm:$0xff]  }
 0x2ac   : > { %2984 = vmatprep.subr.bf16.mxu1 %v3564_v0 }
 0x340   : > { %v649_v62 = vpop.f32.mrb[0].mxu1  ;;  %v3822_v63 = vpop.f32.mrb[8].mxu0 }
 0x341   : > { %v3824_v1 = vpop.f32.mrb[1].mxu1  ;;  %v3826_v2 = vpop.f32.mrb[9].mxu0  ;;  %v1160_v16 = vadd.f32 %v2712_v11, %v649_v62 }
 0x342   : > { %v653_v3 = vpop.f32.mrb[2].mxu1  ;;  %v694_v4 = vpop.f32.mrb[10].mxu0 }
 0x343   : > { %v654_v5 = vpop.f32.mrb[3].mxu1  ;;  %v695_v6 = vpop.f32.mrb[11].mxu0  ;;  %v1161_v20 = vadd.f32 1.0, %v1160_v16 }
 0x348   : > { %v3828_v7 = vpop.f32.mrb[4].mxu1  ;;  %v3830_v8 = vpop.f32.mrb[12].mxu0 }
 0x349   : > { %v3832_v9 = vpop.f32.mrb[5].mxu1  ;;  %v3834_v10 = vpop.f32.mrb[13].mxu0 }
 0x34a   : > { %v735_v12 = vpop.f32.mrb[6].mxu1  ;;  %v776_v13 = vpop.f32.mrb[14].mxu0 }
 0x34b   : > { %v736_v14 = vpop.f32.mrb[7].mxu1  ;;  %v777_v15 = vpop.f32.mrb[15].mxu0 }
 0x350   : > { %v3836_v18 = vpop.f32.mrb[8].mxu1  ;;  %v978_v19 = vpop.f32.mrb[16].mxu0 }
 0x351   : > { %v1154_v21 = vadd.f32 %v2711_v17, %v978_v19  ;;  %v2942_v22 = vpop.f32.mrb[9].mxu1  ;;  %v3838_v23 = vpop.f32.mrb[17].mxu0 }
 0x352   : > { %v816_v24 = vpop.f32.mrb[10].mxu1  ;;  %v982_v25 = vpop.f32.mrb[18].mxu0 }
 0x353   : > { %v3840_v26 = vmul.f32 %v1161_v20, %v1154_v21  ;;  %v2943_v27 = vpop.f32.mrb[11].mxu1  ;;  %v983_v28 = vpop.f32.mrb[19].mxu0  ;;  %v2724_v24 = vld [vmem:[#allocation7 + $0x1c] ss:$0 sm:$0xff] }
 0x354   : > { %v1311_v25 = vadd.f32 %v2724_v24, %v3824_v1  ;;  %v2723_v27 = vld [vmem:[#allocation7 + $0x1] ss:$0 sm:$0xff] }
 0x355   : > { %1163 = vadd.xlane.f32.xlu0 %v3840_v26  ;;  %v1165_v29 = vmul.f32 %v3840_v26, %v3840_v26  ;;  %v3261_v1 = vld [vmem:[%s4079_s4 + $0x10] ss:$40 sps:$4 sm:$0xff]  }
 0x356   : > { %v1312_v31 = vadd.f32 1.0, %v1311_v25  ;;  %1027 = vmatpush1.bf16.msra.mxu0 %v3261_v1 }
 0x359   : > { %1166 = vadd.xlane.f32.xlu0 %v1165_v29  ;;  %v3888_v14 = vpop.f32.mrb[12].mxu1 }
 0x35a   : > { %v3890_v15 = vpop.f32.mrb[13].mxu1 }
 0x35b   : > { %v1023_v16 = vpop.f32.mrb[14].mxu1 }
 0x35c   : > { %v1024_v17 = vpop.f32.mrb[15].mxu1 }
 0x361   : > { %v3892_v19 = vpop.f32.mrb[16].mxu1 }
 0x362   : > { %v3894_v20 = vpop.f32.mrb[17].mxu1 }
 0x363   : > { %v1105_v21 = vpop.f32.mrb[18].mxu1 }
 0x364   : > { %v1106_v22 = vpop.f32.mrb[19].mxu1 }
 0x3e2   : > { %v1164_v47 = vpop.xlane.xlu0 %1163 }
 0x3e3   : > { %v1168_v48 = vmul.f32 0.0078125, %v1164_v47  ;;  %v3279_v47 = vld [vmem:[#allocation5 + $0x70] sm:$0xff]  }
 0x3e5   : > { %v1170_v50 = vmul.f32 %v1168_v48, %v1168_v48  ;;  %v1172_v54 = vsub.f32 %v3840_v26, %v1168_v48  ;;  %v3280_v48 = vld [vmem:[#allocation5 + $0x78] sm:$0xff]  }
 0x3e6   : > { %v1167_v49 = vpop.xlane.xlu0 %1166 }
 0x3e7   : > { %v1169_v51 = vmul.f32 0.0078125, %v1167_v49 }
 0x3e9   : > { %v1171_v52 = vsub.f32 %v1169_v51, %v1170_v50 }
 0x3eb   : > { %v1173_v53 = vadd.f32 1e-05, %v1171_v52 }
 0x3ed   : > { %3345 = vrsqrt.f32 %v1173_v53 }
 0x3f7   : > { %v3346_v55 = vpop.eup %3345 }
 0x3f8   : > { %v1175_v57 = vmul.f32 %v3346_v55, %v1172_v54 }
 0x3fa   : > { %v1181_v59 = vmul.f32 %v2713_v56, %v1175_v57 }
 0x3fc   : > { %v1187_v60 = vadd.f32 %v2714_v58, %v1181_v59  ;;  %v2725_v58 = vld [vmem:[#allocation7 + $0xa] ss:$0 sm:$0xff] }
 0x3fe   : > { %v1188_v62 = vmax.f32 %v1187_v60, -60.0 }
 0x400   : > { %v1189_v3 = vsub.f32 0.0, %v1188_v62 }
 0x402   : > { %v1190_v4 = vmul.f32 1.442695, %v1189_v3 }
 0x404   : > { %3347 = vpow2.f32 %v1190_v4 }
 0x40e   : > { %v3348_v5 = vpop.eup %3347 }
 0x40f   : > { %v1192_v6 = vadd.f32 1.0, %v3348_v5 }
 0x411   : > { %3349 = vrcp.f32 %v1192_v6 }
 0x41b   : > { %v3350_v11 = vpop.eup %3349 }
 0x41c   : > { %v1194_v12 = vmul.f32 %v3350_v11, %v1187_v60  ;;  %v2726_v60 = vld [vmem:[#allocation7 + $0x13] ss:$0 sm:$0xff] }
 0x41e   : > { %v1195_v13 = vpack.c.bf16 %v1194_v12, %v1194_v12 }
 0x420   : > { %2961 = vmatmul.mubr.bf16.vlgmr.msra.gmra.mrb[20].mxu1 %v1195_v13 }
 0x421   : > { %3000 = vmatprep.mubr.msk.bf16.mxu1 %vm3565_vm0, %v3564_v0 }
 0x4f3   : > { %v1294_v26 = vpop.f32.mrb[20].mxu1 }
 0x4f4   : > { %v1295_v28 = vadd.f32 %v1294_v26, %v3838_v23  ;;  %v2962_v29 = vpop.f32.mrb[21].mxu1  ;;  %v3266_v23 = vld [vmem:[%s4079_s4 + $0x64] ss:$40 sps:$4 sm:$0xff]  }
 0x4f5   : > { %v1297_v30 = vpop.f32.mrb[22].mxu1  ;;  %1028 = vmatprep.subr.bf16.mxu0 %v3266_v23 }
 0x4f6   : > { %v1305_v33 = vadd.f32 %v2723_v27, %v1295_v28  ;;  %v2963_v34 = vpop.f32.mrb[23].mxu1  ;;  %1029 = vmatpush1.bf16.msra.mxu0 %v3264_v38  ;;  %v2736_v30 = vld [vmem:[#allocation7 + $0x1d] ss:$0 sm:$0xff] }
 0x4f7   : > { %1108 = vmatprep.subr.bf16.mxu0 %v3269_v39  ;;  %v2735_v34 = vld [vmem:[#allocation7 + $0x2] ss:$0 sm:$0xff] }
 0x4f8   : > { %v1313_v35 = vmul.f32 %v1312_v31, %v1305_v33  ;;  %v1463_v31 = vadd.f32 %v2736_v30, %v3822_v63  ;;  %v3283_v63 = vld [vmem:[#allocation5 + $0x90] sm:$0xff]  }
 0x4f9   : > { %2708 = vmatmul.mubr.msk.bf16.vlgmr.msra.gmra.mrb[20].mxu0 %vm448_vm2, %v3815_v61 }
 0x4fa   : > { %1314 = vadd.xlane.f32.xlu1 %v1313_v35  ;;  %v1316_v36 = vmul.f32 %v1313_v35, %v1313_v35  ;;  %1109 = vmatpush1.bf16.msra.mxu0 %v3267_v40  ;;  %v1464_v1 = vadd.f32 1.0, %v1463_v31 }
 0x4fb   : > { %1140 = vmatprep.mubr.bf16.mxu0 %v3566_v32  ;;  %1110 = vmatprep.subr.bf16.mxu0 %v3272_v41  ;;  %v3276_v32 = vld [vmem:[#allocation5 + $0x58] sm:$0xff]   ;;  %v3281_v41 = vld [vmem:[#allocation5 + $0x80] sm:$0xff]  }
 0x4fc   : > { %2985 = vmatpush3.bf16.msra.mxu1 %v3281_v41 }
 0x4fd   : > { %2986 = vmatprep.subr.bf16.mxu1 %v3564_v0 }
 0x4fe   : > { %1317 = vadd.xlane.f32.xlu1 %v1316_v36  ;;  %1111 = vmatpush1.bf16.msra.mxu0 %v3270_v42  ;;  %v3282_v42 = vld [vmem:[#allocation5 + $0x88] sm:$0xff]  }
 0x4ff   : > { %2964 = vmatprep.subr.bf16.mxu0 %v3564_v0 }
 0x500   : > { %2987 = vmatpush3.bf16.msra.mxu1 %v3282_v42 }
 0x501   : > { %2710 = vmatmul.mubr.msk.bf16.vlgmr.msra.gmra.mrb[24].mxu0 %vm448_vm2, %v3815_v61  ;;  %v3278_v61 = vld [vmem:[#allocation5 + $0x68] sm:$0xff]   ;;  %2988 = vmatprep.subr.bf16.mxu1 %v3564_v0 }
 0x502   : > { %2965 = vmatpush3.bf16.msra.mxu0 %v3273_v43  ;;  %2980 = vmatprep.mubr.msk.bf16.mxu0 %vm3565_vm0, %v3564_v0  ;;  %v3285_v43 = vld [vmem:[#allocation5 + $0xa0] sm:$0xff]  }
 0x503   : > { %2966 = vmatprep.subr.bf16.mxu0 %v3564_v0 }
 0x504   : > { %2989 = vmatpush3.bf16.msra.mxu1 %v3283_v63 }
 0x505   : > { %2990 = vmatprep.subr.bf16.mxu1 %v3564_v0 }
 0x506   : > { %2967 = vmatpush3.bf16.msra.mxu0 %v3274_v44  ;;  %v3286_v44 = vld [vmem:[#allocation5 + $0xa8] sm:$0xff]  }
 0x507   : > { %2968 = vmatprep.subr.bf16.mxu0 %v3564_v0 }
 0x50a   : > { %2969 = vmatpush3.bf16.msra.mxu0 %v3275_v45  ;;  %v3287_v45 = vld [vmem:[#allocation5 + $0xb0] sm:$0xff]  }
 0x50b   : > { %2970 = vmatprep.subr.bf16.mxu0 %v3564_v0 }
 0x50e   : > { %2971 = vmatpush3.bf16.msra.mxu0 %v3276_v32  ;;  %v3288_v32 = vld [vmem:[#allocation5 + $0xb8] sm:$0xff]  }
 0x50f   : > { %2972 = vmatprep.subr.bf16.mxu0 %v3564_v0 }
 0x512   : > { %2973 = vmatpush3.bf16.msra.mxu0 %v3277_v46 }
 0x513   : > { %2974 = vmatprep.subr.bf16.mxu0 %v3564_v0 }
 0x516   : > { %2975 = vmatpush3.bf16.msra.mxu0 %v3278_v61 }
 0x517   : > { %2976 = vmatprep.subr.bf16.mxu0 %v3564_v0 }
 0x51a   : > { %2977 = vmatpush3.bf16.msra.mxu0 %v3279_v47 }
 0x51b   : > { %2978 = vmatprep.subr.bf16.mxu0 %v3564_v0 }
 0x51e   : > { %2979 = vmatpush3.bf16.msra.mxu0 %v3280_v48 }
 0x51f   : > { %3004 = vmatprep.subr.bf16.mxu0 %v3564_v0 }
 0x587   : > { %v1315_v49 = vpop.xlane.xlu1 %1314 }
 0x588   : > { %v1319_v50 = vmul.f32 0.0078125, %v1315_v49 }
 0x58a   : > { %v1321_v52 = vmul.f32 %v1319_v50, %v1319_v50  ;;  %v1323_v56 = vsub.f32 %v1313_v35, %v1319_v50 }
 0x58b   : > { %v1318_v51 = vpop.xlane.xlu1 %1317 }
 0x58c   : > { %v1320_v53 = vmul.f32 0.0078125, %v1318_v51 }
 0x58e   : > { %v1322_v54 = vsub.f32 %v1320_v53, %v1321_v52 }
 0x590   : > { %v1324_v55 = vadd.f32 1e-05, %v1322_v54  ;;  %v2737_v54 = vld [vmem:[#allocation7 + $0xb] ss:$0 sm:$0xff] }
 0x592   : > { %3351 = vrsqrt.f32 %v1324_v55 }
 0x59c   : > { %v3352_v57 = vpop.eup %3351 }
 0x59d   : > { %v1326_v59 = vmul.f32 %v3352_v57, %v1323_v56  ;;  %v2738_v56 = vld [vmem:[#allocation7 + $0x14] ss:$0 sm:$0xff] }
 0x59f   : > { %v1332_v62 = vmul.f32 %v2725_v58, %v1326_v59 }
 0x5a1   : > { %v1338_v3 = vadd.f32 %v2726_v60, %v1332_v62 }
 0x5a3   : > { %v1339_v4 = vmax.f32 %v1338_v3, -60.0 }
 0x5a5   : > { %v1340_v5 = vsub.f32 0.0, %v1339_v4 }
 0x5a7   : > { %v1341_v6 = vmul.f32 1.442695, %v1340_v5 }
 0x5a9   : > { %3353 = vpow2.f32 %v1341_v6 }
 0x5b3   : > { %v3354_v11 = vpop.eup %3353 }
 0x5b4   : > { %v1343_v12 = vadd.f32 1.0, %v3354_v11 }
 0x5b6   : > { %3355 = vrcp.f32 %v1343_v12  ;;  %v2748_v12 = vld [vmem:[#allocation7 + $0x1e] ss:$0 sm:$0xff] }
 0x5c0   : > { %v3356_v13 = vpop.eup %3355 }
 0x5c1   : > { %v1345_v16 = vmul.f32 %v3356_v13, %v1338_v3  ;;  %v1615_v13 = vadd.f32 %v2748_v12, %v3826_v2  ;;  %v3291_v2 = vld [vmem:[#allocation5 + $0xd0] sm:$0xff]  }
 0x5c3   : > { %v1346_v17 = vpack.c.bf16 %v1345_v16, %v1345_v16 }
 0x5c5   : > { %2981 = vmatmul.mubr.bf16.vlgmr.msra.gmra.mrb[28].mxu0 %v1346_v17  ;;  %v2747_v17 = vld [vmem:[#allocation7 + $0x3] ss:$0 sm:$0xff] }
 0x5c6   : > { %3020 = vmatprep.mubr.msk.bf16.mxu0 %vm3565_vm0, %v3564_v0 }
 0x5cc   : > { %v3940_v21 = vpop.f32.mrb[20].mxu0 }
 0x5cd   : > { %v3942_v22 = vpop.f32.mrb[21].mxu0 }
 0x5ce   : > { %v1064_v24 = vpop.f32.mrb[22].mxu0 }
 0x5cf   : > { %v1065_v25 = vpop.f32.mrb[23].mxu0 }
 0x5d4   : > { %v3944_v26 = vpop.f32.mrb[24].mxu0 }
 0x5d5   : > { %v3946_v27 = vpop.f32.mrb[25].mxu0 }
 0x5d6   : > { %v1146_v28 = vpop.f32.mrb[26].mxu0 }
 0x5d7   : > { %v1147_v29 = vpop.f32.mrb[27].mxu0 }
 0x5d8   : > { %v1616_v29 = vadd.f32 1.0, %v1615_v13 }
 0x698   : > { %v1446_v33 = vpop.f32.mrb[28].mxu0 }
 0x699   : > { %v1447_v35 = vadd.f32 %v1446_v33, %v3888_v14  ;;  %v2982_v36 = vpop.f32.mrb[29].mxu0  ;;  %v3284_v14 = vld [vmem:[#allocation5 + $0x98] sm:$0xff]  }
 0x69a   : > { %v1449_v37 = vpop.f32.mrb[30].mxu0  ;;  %2991 = vmatpush3.bf16.msra.mxu1 %v3284_v14  ;;  %v3290_v36 = vld [vmem:[#allocation5 + $0xc8] sm:$0xff]  }
 0x69b   : > { %v1457_v23 = vadd.f32 %v2735_v34, %v1447_v35  ;;  %v2983_v38 = vpop.f32.mrb[31].mxu0  ;;  %2992 = vmatprep.subr.bf16.mxu1 %v3564_v0  ;;  %v3289_v35 = vld [vmem:[#allocation5 + $0xc0] sm:$0xff]  }
 0x69c   : > { %3005 = vmatpush3.bf16.msra.mxu0 %v3289_v35  ;;  %v3293_v37 = vld [vmem:[#allocation5 + $0xe0] sm:$0xff]   ;;  %v3296_v38 = vld [vmem:[#allocation5 + $0xf8] sm:$0xff]  }
 0x69d   : > { %v1465_v39 = vmul.f32 %v1464_v1, %v1457_v23  ;;  %3006 = vmatprep.subr.bf16.mxu0 %v3564_v0  ;;  %v3294_v1 = vld [vmem:[#allocation5 + $0xe8] sm:$0xff]   ;;  %v3295_v23 = vld [vmem:[#allocation5 + $0xf0] sm:$0xff]  }
 0x69e   : > { %2993 = vmatpush3.bf16.msra.mxu1 %v3285_v43 }
 0x69f   : > { %1466 = vadd.xlane.f32.xlu0 %v1465_v39  ;;  %v1468_v40 = vmul.f32 %v1465_v39, %v1465_v39  ;;  %2994 = vmatprep.subr.bf16.mxu1 %v3564_v0 }
 0x6a0   : > { %3007 = vmatpush3.bf16.msra.mxu0 %v3290_v36 }
 0x6a1   : > { %1469 = vadd.xlane.f32.xlu1 %v1468_v40  ;;  %3008 = vmatprep.subr.bf16.mxu0 %v3564_v0 }
 0x6a2   : > { %2995 = vmatpush3.bf16.msra.mxu1 %v3286_v44 }
 0x6a3   : > { %2996 = vmatprep.subr.bf16.mxu1 %v3564_v0 }
 0x6a4   : > { %3009 = vmatpush3.bf16.msra.mxu0 %v3291_v2 }
 0x6a5   : > { %3010 = vmatprep.subr.bf16.mxu0 %v3564_v0 }
 0x6a6   : > { %2997 = vmatpush3.bf16.msra.mxu1 %v3287_v45 }
 0x6a7   : > { %2998 = vmatprep.subr.bf16.mxu1 %v3564_v0 }
 0x6aa   : > { %2999 = vmatpush3.bf16.msra.mxu1 %v3288_v32  ;;  %v2749_v32 = vld [vmem:[#allocation7 + $0xc] ss:$0 sm:$0xff] }
 0x6ab   : > { %3024 = vmatprep.subr.bf16.mxu1 %v3564_v0 }
 0x72c   : > { %v1467_v46 = vpop.xlane.xlu0 %1466 }
 0x72d   : > { %v1471_v61 = vmul.f32 0.0078125, %v1467_v46 }
 0x72e   : > { %v1470_v47 = vpop.xlane.xlu1 %1469 }
 0x72f   : > { %v1473_v48 = vmul.f32 %v1471_v61, %v1471_v61  ;;  %v1472_v49 = vmul.f32 0.0078125, %v1470_v47  ;;  %v1475_v52 = vsub.f32 %v1465_v39, %v1471_v61  ;;  %v2750_v61 = vld [vmem:[#allocation7 + $0x15] ss:$0 sm:$0xff] }
 0x731   : > { %v1474_v50 = vsub.f32 %v1472_v49, %v1473_v48 }
 0x733   : > { %v1476_v51 = vadd.f32 1e-05, %v1474_v50 }
 0x735   : > { %3357 = vrsqrt.f32 %v1476_v51 }
 0x73f   : > { %v3358_v53 = vpop.eup %3357 }
 0x740   : > { %v1478_v55 = vmul.f32 %v3358_v53, %v1475_v52 }
 0x742   : > { %v1484_v57 = vmul.f32 %v2737_v54, %v1478_v55 }
 0x744   : > { %v1490_v58 = vadd.f32 %v2738_v56, %v1484_v57  ;;  %v2760_v57 = vld [vmem:[#allocation7 + $0x1f] ss:$0 sm:$0xff] }
 0x746   : > { %v1491_v59 = vmax.f32 %v1490_v58, -60.0 }
 0x748   : > { %v1492_v60 = vsub.f32 0.0, %v1491_v59 }
 0x74a   : > { %v1493_v62 = vmul.f32 1.442695, %v1492_v60  ;;  %v2759_v60 = vld [vmem:[#allocation7 + $0x4] ss:$0 sm:$0xff] }
 0x74c   : > { %3359 = vpow2.f32 %v1493_v62 }
 0x756   : > { %v3360_v3 = vpop.eup %3359 }
 0x757   : > { %v1495_v4 = vadd.f32 1.0, %v3360_v3 }
 0x759   : > { %3361 = vrcp.f32 %v1495_v4 }
 0x763   : > { %v3362_v5 = vpop.eup %3361 }
 0x764   : > { %v1497_v6 = vmul.f32 %v3362_v5, %v1490_v58  ;;  %v1767_v58 = vadd.f32 %v2760_v57, %v3828_v7  ;;  %v3299_v7 = vld [vmem:[#allocation5 + $0x110] sm:$0xff]   ;;  %v3305_v57 = vld [vmem:[#allocation5 + $0x140] sm:$0xff]  }
 0x766   : > { %v1498_v11 = vpack.c.bf16 %v1497_v6, %v1497_v6  ;;  %v1768_v5 = vadd.f32 1.0, %v1767_v58  ;;  %v3306_v58 = vld [vmem:[#allocation5 + $0x148] sm:$0xff]  }
 0x768   : > { %3001 = vmatmul.mubr.bf16.vlgmr.msra.gmra.mrb[24].mxu1 %v1498_v11 }
 0x769   : > { %3040 = vmatprep.mubr.msk.bf16.mxu1 %vm3565_vm0, %v3564_v0 }
 0x83b   : > { %v1598_v16 = vpop.f32.mrb[24].mxu1 }
 0x83c   : > { %v1599_v24 = vadd.f32 %v1598_v16, %v3890_v15  ;;  %v3002_v25 = vpop.f32.mrb[25].mxu1  ;;  %v3292_v15 = vld [vmem:[#allocation5 + $0xd8] sm:$0xff]   ;;  %v3297_v16 = vld [vmem:[#allocation5 + $0x100] sm:$0xff]  }
 0x83d   : > { %v1601_v28 = vpop.f32.mrb[26].mxu1  ;;  %3011 = vmatpush3.bf16.msra.mxu0 %v3292_v15  ;;  %3025 = vmatpush3.bf16.msra.mxu1 %v3297_v16  ;;  %v3302_v25 = vld [vmem:[#allocation5 + $0x128] sm:$0xff]  }
 0x83e   : > { %v1609_v30 = vadd.f32 %v2747_v17, %v1599_v24  ;;  %v3003_v31 = vpop.f32.mrb[27].mxu1  ;;  %3012 = vmatprep.subr.bf16.mxu0 %v3564_v0  ;;  %v3298_v17 = vld [vmem:[#allocation5 + $0x108] sm:$0xff]   ;;  %3026 = vmatprep.subr.bf16.mxu1 %v3564_v0  ;;  %v3301_v24 = vld [vmem:[#allocation5 + $0x120] sm:$0xff]   ;;  %v3303_v28 = vld [vmem:[#allocation5 + $0x130] sm:$0xff]  }
 0x840   : > { %v1617_v33 = vmul.f32 %v1616_v29, %v1609_v30  ;;  %v3304_v29 = vld [vmem:[#allocation5 + $0x138] sm:$0xff]  }
 0x841   : > { %3013 = vmatpush3.bf16.msra.mxu0 %v3293_v37  ;;  %3027 = vmatpush3.bf16.msra.mxu1 %v3298_v17 }
 0x842   : > { %1618 = vadd.xlane.f32.xlu0 %v1617_v33  ;;  %v1620_v34 = vmul.f32 %v1617_v33, %v1617_v33  ;;  %3014 = vmatprep.subr.bf16.mxu0 %v3564_v0 }
 0x843   : > { %3028 = vmatprep.subr.bf16.mxu1 %v3564_v0 }
 0x844   : > { %1621 = vadd.xlane.f32.xlu1 %v1620_v34 }
 0x845   : > { %3015 = vmatpush3.bf16.msra.mxu0 %v3294_v1  ;;  %3029 = vmatpush3.bf16.msra.mxu1 %v3299_v7  ;;  %v2761_v1 = vld [vmem:[#allocation7 + $0xd] ss:$0 sm:$0xff] }
 0x846   : > { %3016 = vmatprep.subr.bf16.mxu0 %v3564_v0  ;;  %3030 = vmatprep.subr.bf16.mxu1 %v3564_v0 }
 0x849   : > { %3017 = vmatpush3.bf16.msra.mxu0 %v3295_v23 }
 0x84a   : > { %3018 = vmatprep.subr.bf16.mxu0 %v3564_v0 }
 0x84d   : > { %3019 = vmatpush3.bf16.msra.mxu0 %v3296_v38  ;;  %v2762_v38 = vld [vmem:[#allocation7 + $0x16] ss:$0 sm:$0xff] }
 0x84e   : > { %3044 = vmatprep.subr.bf16.mxu0 %v3564_v0 }
 0x8cf   : > { %v1619_v39 = vpop.xlane.xlu0 %1618 }
 0x8d0   : > { %v1623_v40 = vmul.f32 0.0078125, %v1619_v39 }
 0x8d1   : > { %v1622_v41 = vpop.xlane.xlu1 %1621 }
 0x8d2   : > { %v1625_v42 = vmul.f32 %v1623_v40, %v1623_v40  ;;  %v1624_v63 = vmul.f32 0.0078125, %v1622_v41  ;;  %v1627_v44 = vsub.f32 %v1617_v33, %v1623_v40 }
 0x8d4   : > { %v1626_v14 = vsub.f32 %v1624_v63, %v1625_v42 }
 0x8d6   : > { %v1628_v43 = vadd.f32 1e-05, %v1626_v14 }
 0x8d8   : > { %3363 = vrsqrt.f32 %v1628_v43 }
 0x8e2   : > { %v3364_v45 = vpop.eup %3363 }
 0x8e3   : > { %v1630_v46 = vmul.f32 %v3364_v45, %v1627_v44 }
 0x8e5   : > { %v1636_v47 = vmul.f32 %v2749_v32, %v1630_v46  ;;  %v2772_v46 = vld [vmem:[#allocation7 + $0x20] ss:$0 sm:$0xff] }
 0x8e7   : > { %v1642_v48 = vadd.f32 %v2750_v61, %v1636_v47  ;;  %v1919_v61 = vadd.f32 %v2772_v46, %v3832_v9  ;;  %v3307_v9 = vld [vmem:[#allocation5 + $0x150] sm:$0xff]   ;;  %v3317_v46 = vld [vmem:[#allocation5 + $0x1a0] sm:$0xff]  }
 0x8e9   : > { %v1643_v49 = vmax.f32 %v1642_v48, -60.0 }
 0x8eb   : > { %v1644_v50 = vsub.f32 0.0, %v1643_v49 }
 0x8ed   : > { %v1645_v51 = vmul.f32 1.442695, %v1644_v50 }
 0x8ef   : > { %3365 = vpow2.f32 %v1645_v51 }
 0x8f9   : > { %v3366_v52 = vpop.eup %3365 }
 0x8fa   : > { %v1647_v53 = vadd.f32 1.0, %v3366_v52  ;;  %v1920_v52 = vadd.f32 1.0, %v1919_v61  ;;  %v3318_v61 = vld [vmem:[#allocation5 + $0x1a8] sm:$0xff]  }
 0x8fc   : > { %3367 = vrcp.f32 %v1647_v53 }
 0x906   : > { %v3368_v54 = vpop.eup %3367 }
 0x907   : > { %v1649_v55 = vmul.f32 %v3368_v54, %v1642_v48  ;;  %v2771_v48 = vld [vmem:[#allocation7 + $0x5] ss:$0 sm:$0xff] }
 0x909   : > { %v1650_v56 = vpack.c.bf16 %v1649_v55, %v1649_v55 }
 0x90b   : > { %3021 = vmatmul.mubr.bf16.vlgmr.msra.gmra.mrb[32].mxu0 %v1650_v56 }
 0x90c   : > { %3060 = vmatprep.mubr.msk.bf16.mxu0 %vm3565_vm0, %v3564_v0  ;;  %3045 = vmatpush3.bf16.msra.mxu0 %v3305_v57 }
 0x90d   : > { %3046 = vmatprep.subr.bf16.mxu0 %v3564_v0 }
 0x910   : > { %3047 = vmatpush3.bf16.msra.mxu0 %v3306_v58  ;;  %v2785_v58 = vld [vmem:[#allocation7 + $0xf] ss:$0 sm:$0xff] }
 0x911   : > { %3048 = vmatprep.subr.bf16.mxu0 %v3564_v0 }
 0x914   : > { %3049 = vmatpush3.bf16.msra.mxu0 %v3307_v9 }
 0x915   : > { %3050 = vmatprep.subr.bf16.mxu0 %v3564_v0 }
 0x9de   : > { %v1750_v59 = vpop.f32.mrb[32].mxu0 }
 0x9df   : > { %v1751_v62 = vadd.f32 %v1750_v59, %v3940_v21  ;;  %v3022_v3 = vpop.f32.mrb[33].mxu0  ;;  %v3300_v21 = vld [vmem:[#allocation5 + $0x118] sm:$0xff]   ;;  %v3309_v59 = vld [vmem:[#allocation5 + $0x160] sm:$0xff]  }
 0x9e0   : > { %v1753_v4 = vpop.f32.mrb[34].mxu0  ;;  %3031 = vmatpush3.bf16.msra.mxu1 %v3300_v21  ;;  %v3312_v3 = vld [vmem:[#allocation5 + $0x178] sm:$0xff]   ;;  %v2773_v21 = vld [vmem:[#allocation7 + $0xe] ss:$0 sm:$0xff] }
 0x9e1   : > { %v1761_v6 = vadd.f32 %v2759_v60, %v1751_v62  ;;  %v3023_v11 = vpop.f32.mrb[35].mxu0  ;;  %3032 = vmatprep.subr.bf16.mxu1 %v3564_v0  ;;  %v3310_v60 = vld [vmem:[#allocation5 + $0x168] sm:$0xff]   ;;  %v3311_v62 = vld [vmem:[#allocation5 + $0x170] sm:$0xff]  }
 0x9e3   : > { %v1769_v12 = vmul.f32 %v1768_v5, %v1761_v6 }
 0x9e4   : > { %3033 = vmatpush3.bf16.msra.mxu1 %v3301_v24 }
 0x9e5   : > { %1770 = vadd.xlane.f32.xlu0 %v1769_v12  ;;  %v1772_v13 = vmul.f32 %v1769_v12, %v1769_v12  ;;  %3034 = vmatprep.subr.bf16.mxu1 %v3564_v0 }
 0x9e7   : > { %1773 = vadd.xlane.f32.xlu1 %v1772_v13 }
 0x9e8   : > { %3035 = vmatpush3.bf16.msra.mxu1 %v3302_v25  ;;  %v2774_v25 = vld [vmem:[#allocation7 + $0x17] ss:$0 sm:$0xff] }
 0x9e9   : > { %3036 = vmatprep.subr.bf16.mxu1 %v3564_v0 }
 0x9ec   : > { %3037 = vmatpush3.bf16.msra.mxu1 %v3303_v28 }
 0x9ed   : > { %3038 = vmatprep.subr.bf16.mxu1 %v3564_v0 }
 0x9f0   : > { %3039 = vmatpush3.bf16.msra.mxu1 %v3304_v29 }
 0x9f1   : > { %3064 = vmatprep.subr.bf16.mxu1 %v3564_v0 }
 0xa72   : > { %v1771_v30 = vpop.xlane.xlu0 %1770 }
 0xa73   : > { %v1775_v31 = vmul.f32 0.0078125, %v1771_v30 }
 0xa74   : > { %v1774_v33 = vpop.xlane.xlu1 %1773 }
 0xa75   : > { %v1777_v34 = vmul.f32 %v1775_v31, %v1775_v31  ;;  %v1776_v35 = vmul.f32 0.0078125, %v1774_v33  ;;  %v1779_v15 = vsub.f32 %v1769_v12, %v1775_v31 }
 0xa77   : > { %v1778_v36 = vsub.f32 %v1776_v35, %v1777_v34 }
 0xa79   : > { %v1780_v2 = vadd.f32 1e-05, %v1778_v36 }
 0xa7b   : > { %3369 = vrsqrt.f32 %v1780_v2 }
 0xa85   : > { %v3370_v37 = vpop.eup %3369 }
 0xa86   : > { %v1782_v23 = vmul.f32 %v3370_v37, %v1779_v15  ;;  %v2784_v37 = vld [vmem:[#allocation7 + $0x21] ss:$0 sm:$0xff] }
 0xa88   : > { %v1788_v39 = vmul.f32 %v2761_v1, %v1782_v23  ;;  %v2071_v1 = vadd.f32 %v2784_v37, %v3830_v8  ;;  %v3315_v8 = vld [vmem:[#allocation5 + $0x190] sm:$0xff]  }
 0xa89   : > { %v3327_v37 = vld [vmem:[#allocation5 + $0x1f0] sm:$0xff]  }
 0xa8a   : > { %v1794_v40 = vadd.f32 %v2762_v38, %v1788_v39  ;;  %v2783_v38 = vld [vmem:[#allocation7 + $0x6] ss:$0 sm:$0xff] }
 0xa8c   : > { %v1795_v41 = vmax.f32 %v1794_v40, -60.0 }
 0xa8e   : > { %v1796_v42 = vsub.f32 0.0, %v1795_v41 }
 0xa90   : > { %v1797_v63 = vmul.f32 1.442695, %v1796_v42  ;;  %v2072_v42 = vadd.f32 1.0, %v2071_v1  ;;  %v3328_v1 = vld [vmem:[#allocation5 + $0x1f8] sm:$0xff]  }
 0xa92   : > { %3371 = vpow2.f32 %v1797_v63 }
 0xa9c   : > { %v3372_v14 = vpop.eup %3371 }
 0xa9d   : > { %v1799_v43 = vadd.f32 1.0, %v3372_v14 }
 0xa9f   : > { %3373 = vrcp.f32 %v1799_v43 }
 0xaa9   : > { %v3374_v44 = vpop.eup %3373 }
 0xaaa   : > { %v1801_v45 = vmul.f32 %v3374_v44, %v1794_v40 }
 0xaac   : > { %v1802_v32 = vpack.c.bf16 %v1801_v45, %v1801_v45  ;;  %v3313_v45 = vld [vmem:[#allocation5 + $0x180] sm:$0xff]  }
 0xaae   : > { %3041 = vmatmul.mubr.bf16.vlgmr.msra.gmra.mrb[28].mxu1 %v1802_v32  ;;  %v3314_v32 = vld [vmem:[#allocation5 + $0x188] sm:$0xff]  }
 0xaaf   : > { %3080 = vmatprep.mubr.msk.bf16.mxu1 %vm3565_vm0, %v3564_v0  ;;  %3065 = vmatpush3.bf16.msra.mxu1 %v3313_v45 }
 0xab0   : > { %3066 = vmatprep.subr.bf16.mxu1 %v3564_v0 }
 0xab3   : > { %3067 = vmatpush3.bf16.msra.mxu1 %v3314_v32  ;;  %v2798_v32 = vld [vmem:[#allocation7 + $0x19] ss:$0 sm:$0xff] }
 0xab4   : > { %3068 = vmatprep.subr.bf16.mxu1 %v3564_v0 }
 0xab7   : > { %3069 = vmatpush3.bf16.msra.mxu1 %v3315_v8 }
 0xab8   : > { %3070 = vmatprep.subr.bf16.mxu1 %v3564_v0 }
 0xb81   : > { %v1902_v47 = vpop.f32.mrb[28].mxu1 }
 0xb82   : > { %v1903_v49 = vadd.f32 %v1902_v47, %v3942_v22  ;;  %v3042_v50 = vpop.f32.mrb[29].mxu1  ;;  %v3308_v22 = vld [vmem:[#allocation5 + $0x158] sm:$0xff]   ;;  %v3319_v47 = vld [vmem:[#allocation5 + $0x1b0] sm:$0xff]  }
 0xb83   : > { %v1905_v51 = vpop.f32.mrb[30].mxu1  ;;  %3051 = vmatpush3.bf16.msra.mxu0 %v3308_v22  ;;  %v2786_v22 = vld [vmem:[#allocation7 + $0x18] ss:$0 sm:$0xff] }
 0xb84   : > { %v1913_v53 = vadd.f32 %v2771_v48, %v1903_v49  ;;  %v3043_v54 = vpop.f32.mrb[31].mxu1  ;;  %3052 = vmatprep.subr.bf16.mxu0 %v3564_v0  ;;  %v3320_v48 = vld [vmem:[#allocation5 + $0x1b8] sm:$0xff]  }
 0xb86   : > { %v1921_v55 = vmul.f32 %v1920_v52, %v1913_v53 }
 0xb87   : > { %3053 = vmatpush3.bf16.msra.mxu0 %v3309_v59 }
 0xb88   : > { %1922 = vadd.xlane.f32.xlu0 %v1921_v55  ;;  %v1924_v56 = vmul.f32 %v1921_v55, %v1921_v55  ;;  %3054 = vmatprep.subr.bf16.mxu0 %v3564_v0 }
 0xb8a   : > { %1925 = vadd.xlane.f32.xlu1 %v1924_v56 }
 0xb8b   : > { %3055 = vmatpush3.bf16.msra.mxu0 %v3310_v60 }
 0xb8c   : > { %3056 = vmatprep.subr.bf16.mxu0 %v3564_v0 }
 0xb8f   : > { %3057 = vmatpush3.bf16.msra.mxu0 %v3311_v62 }
 0xb90   : > { %3058 = vmatprep.subr.bf16.mxu0 %v3564_v0 }
 0xb93   : > { %3059 = vmatpush3.bf16.msra.mxu0 %v3312_v3 }
 0xb94   : > { %3084 = vmatprep.subr.bf16.mxu0 %v3564_v0 }
 0xc15   : > { %v1923_v4 = vpop.xlane.xlu0 %1922 }
 0xc16   : > { %v1927_v5 = vmul.f32 0.0078125, %v1923_v4 }
 0xc17   : > { %v1926_v6 = vpop.xlane.xlu1 %1925 }
 0xc18   : > { %v1929_v11 = vmul.f32 %v1927_v5, %v1927_v5  ;;  %v1928_v12 = vmul.f32 0.0078125, %v1926_v6  ;;  %v1931_v17 = vsub.f32 %v1921_v55, %v1927_v5 }
 0xc1a   : > { %v1930_v13 = vsub.f32 %v1928_v12, %v1929_v11 }
 0xc1c   : > { %v1932_v16 = vadd.f32 1e-05, %v1930_v13 }
 0xc1e   : > { %3375 = vrsqrt.f32 %v1932_v16  ;;  %v2796_v16 = vld [vmem:[#allocation7 + $0x22] ss:$0 sm:$0xff] }
 0xc28   : > { %v3376_v7 = vpop.eup %3375 }
 0xc29   : > { %v1934_v24 = vmul.f32 %v3376_v7, %v1931_v17  ;;  %v2223_v17 = vadd.f32 %v2796_v16, %v3834_v10  ;;  %v3323_v10 = vld [vmem:[#allocation5 + $0x1d0] sm:$0xff]  }
 0xc2b   : > { %v1940_v28 = vmul.f32 %v2773_v21, %v1934_v24  ;;  %v2795_v21 = vld [vmem:[#allocation7 + $0x7] ss:$0 sm:$0xff] }
 0xc2d   : > { %v1946_v29 = vadd.f32 %v2774_v25, %v1940_v28 }
 0xc2f   : > { %v1947_v30 = vmax.f32 %v1946_v29, -60.0 }
 0xc31   : > { %v1948_v31 = vsub.f32 0.0, %v1947_v30 }
 0xc33   : > { %v1949_v33 = vmul.f32 1.442695, %v1948_v31 }
 0xc35   : > { %3377 = vpow2.f32 %v1949_v33 }
 0xc3f   : > { %v3378_v34 = vpop.eup %3377 }
 0xc40   : > { %v1951_v35 = vadd.f32 1.0, %v3378_v34 }
 0xc42   : > { %3379 = vrcp.f32 %v1951_v35  ;;  %v3321_v35 = vld [vmem:[#allocation5 + $0x1c0] sm:$0xff]  }
 0xc4c   : > { %v3380_v36 = vpop.eup %3379 }
 0xc4d   : > { %v1953_v2 = vmul.f32 %v3380_v36, %v1946_v29  ;;  %v2224_v29 = vadd.f32 1.0, %v2223_v17  ;;  %v3322_v36 = vld [vmem:[#allocation5 + $0x1c8] sm:$0xff]  }
 0xc4f   : > { %v1954_v15 = vpack.c.bf16 %v1953_v2, %v1953_v2  ;;  %v3325_v2 = vld [vmem:[#allocation5 + $0x1e0] sm:$0xff]  }
 0xc51   : > { %3061 = vmatmul.mubr.bf16.vlgmr.msra.gmra.mrb[36].mxu0 %v1954_v15  ;;  %v3326_v15 = vld [vmem:[#allocation5 + $0x1e8] sm:$0xff]  }
 0xc52   : > { %3100 = vmatprep.mubr.msk.bf16.mxu0 %vm3565_vm0, %v3564_v0  ;;  %3085 = vmatpush3.bf16.msra.mxu0 %v3321_v35 }
 0xc53   : > { %3086 = vmatprep.subr.bf16.mxu0 %v3564_v0 }
 0xc56   : > { %3087 = vmatpush3.bf16.msra.mxu0 %v3322_v36 }
 0xc57   : > { %3088 = vmatprep.subr.bf16.mxu0 %v3564_v0 }
 0xc5a   : > { %3089 = vmatpush3.bf16.msra.mxu0 %v3323_v10 }
 0xc5b   : > { %3090 = vmatprep.subr.bf16.mxu0 %v3564_v0 }
 0xd24   : > { %v2054_v23 = vpop.f32.mrb[36].mxu0 }
 0xd25   : > { %v2055_v39 = vadd.f32 %v2054_v23, %v3892_v19  ;;  %v3062_v40 = vpop.f32.mrb[37].mxu0  ;;  %v3316_v19 = vld [vmem:[#allocation5 + $0x198] sm:$0xff]  }
 0xd26   : > { %v2057_v41 = vpop.f32.mrb[38].mxu0  ;;  %3071 = vmatpush3.bf16.msra.mxu1 %v3316_v19 }
 0xd27   : > { %v2065_v63 = vadd.f32 %v2783_v38, %v2055_v39  ;;  %v3063_v14 = vpop.f32.mrb[39].mxu0  ;;  %3072 = vmatprep.subr.bf16.mxu1 %v3564_v0 }
 0xd29   : > { %v2073_v43 = vmul.f32 %v2072_v42, %v2065_v63 }
 0xd2a   : > { %3073 = vmatpush3.bf16.msra.mxu1 %v3317_v46 }
 0xd2b   : > { %2074 = vadd.xlane.f32.xlu0 %v2073_v43  ;;  %v2076_v44 = vmul.f32 %v2073_v43, %v2073_v43  ;;  %3074 = vmatprep.subr.bf16.mxu1 %v3564_v0 }
 0xd2d   : > { %2077 = vadd.xlane.f32.xlu1 %v2076_v44  ;;  %v2797_v44 = vld [vmem:[#allocation7 + $0x10] ss:$0 sm:$0xff] }
 0xd2e   : > { %3075 = vmatpush3.bf16.msra.mxu1 %v3318_v61 }
 0xd2f   : > { %3076 = vmatprep.subr.bf16.mxu1 %v3564_v0 }
 0xd32   : > { %3077 = vmatpush3.bf16.msra.mxu1 %v3319_v47 }
 0xd33   : > { %3078 = vmatprep.subr.bf16.mxu1 %v3564_v0 }
 0xd36   : > { %3079 = vmatpush3.bf16.msra.mxu1 %v3320_v48 }
 0xd37   : > { %3104 = vmatprep.subr.bf16.mxu1 %v3564_v0 }
 0xdb8   : > { %v2075_v49 = vpop.xlane.xlu0 %2074 }
 0xdb9   : > { %v2079_v50 = vmul.f32 0.0078125, %v2075_v49 }
 0xdba   : > { %v2078_v51 = vpop.xlane.xlu1 %2077 }
 0xdbb   : > { %v2081_v52 = vmul.f32 %v2079_v50, %v2079_v50  ;;  %v2080_v53 = vmul.f32 0.0078125, %v2078_v51  ;;  %v2083_v56 = vsub.f32 %v2073_v43, %v2079_v50 }
 0xdbd   : > { %v2082_v54 = vsub.f32 %v2080_v53, %v2081_v52  ;;  %v2808_v53 = vld [vmem:[#allocation7 + $0x23] ss:$0 sm:$0xff] }
 0xdbf   : > { %v2084_v55 = vadd.f32 1e-05, %v2082_v54  ;;  %v2375_v54 = vadd.f32 %v2808_v53, %v3836_v18  ;;  %v3331_v18 = vld [vmem:[#allocation5 + $0x210] sm:$0xff]  }
 0xdc1   : > { %3381 = vrsqrt.f32 %v2084_v55 }
 0xdcb   : > { %v3382_v57 = vpop.eup %3381 }
 0xdcc   : > { %v2086_v9 = vmul.f32 %v3382_v57, %v2083_v56  ;;  %v2807_v56 = vld [vmem:[#allocation7 + $0x8] ss:$0 sm:$0xff] }
 0xdce   : > { %v2092_v59 = vmul.f32 %v2785_v58, %v2086_v9 }
 0xdd0   : > { %v2098_v60 = vadd.f32 %v2786_v22, %v2092_v59  ;;  %v2376_v22 = vadd.f32 1.0, %v2375_v54 }
 0xdd2   : > { %v2099_v62 = vmax.f32 %v2098_v60, -60.0 }
 0xdd4   : > { %v2100_v3 = vsub.f32 0.0, %v2099_v62 }
 0xdd6   : > { %v2101_v4 = vmul.f32 1.442695, %v2100_v3 }
 0xdd8   : > { %3383 = vpow2.f32 %v2101_v4  ;;  %v3329_v4 = vld [vmem:[#allocation5 + $0x200] sm:$0xff]  }
 0xde2   : > { %v3384_v5 = vpop.eup %3383 }
 0xde3   : > { %v2103_v6 = vadd.f32 1.0, %v3384_v5  ;;  %v3330_v5 = vld [vmem:[#allocation5 + $0x208] sm:$0xff]  }
 0xde5   : > { %3385 = vrcp.f32 %v2103_v6  ;;  %v3333_v6 = vld [vmem:[#allocation5 + $0x220] sm:$0xff]  }
 0xdef   : > { %v3386_v11 = vpop.eup %3385 }
 0xdf0   : > { %v2105_v12 = vmul.f32 %v3386_v11, %v2098_v60  ;;  %v3334_v11 = vld [vmem:[#allocation5 + $0x228] sm:$0xff]  }
 0xdf2   : > { %v2106_v13 = vpack.c.bf16 %v2105_v12, %v2105_v12  ;;  %v3335_v12 = vld [vmem:[#allocation5 + $0x230] sm:$0xff]  }
 0xdf4   : > { %3081 = vmatmul.mubr.bf16.vlgmr.msra.gmra.mrb[32].mxu1 %v2106_v13  ;;  %v3336_v13 = vld [vmem:[#allocation5 + $0x238] sm:$0xff]  }
 0xdf5   : > { %3120 = vmatprep.mubr.msk.bf16.mxu1 %vm3565_vm0, %v3564_v0  ;;  %3105 = vmatpush3.bf16.msra.mxu1 %v3329_v4 }
 0xdf6   : > { %3106 = vmatprep.subr.bf16.mxu1 %v3564_v0 }
 0xdf9   : > { %3107 = vmatpush3.bf16.msra.mxu1 %v3330_v5 }
 0xdfa   : > { %3108 = vmatprep.subr.bf16.mxu1 %v3564_v0 }
 0xdfd   : > { %3109 = vmatpush3.bf16.msra.mxu1 %v3331_v18 }
 0xdfe   : > { %3110 = vmatprep.subr.bf16.mxu1 %v3564_v0 }
 0xec7   : > { %v2206_v7 = vpop.f32.mrb[32].mxu1 }
 0xec8   : > { %v2207_v24 = vadd.f32 %v2206_v7, %v3894_v20  ;;  %v3082_v25 = vpop.f32.mrb[33].mxu1  ;;  %v3324_v20 = vld [vmem:[#allocation5 + $0x1d8] sm:$0xff]  }
 0xec9   : > { %v2209_v28 = vpop.f32.mrb[34].mxu1  ;;  %3091 = vmatpush3.bf16.msra.mxu0 %v3324_v20 }
 0xeca   : > { %v2217_v30 = vadd.f32 %v2795_v21, %v2207_v24  ;;  %v3083_v31 = vpop.f32.mrb[35].mxu1  ;;  %3092 = vmatprep.subr.bf16.mxu0 %v3564_v0 }
 0xecb   : > { %v2809_v31 = vld [vmem:[#allocation7 + $0x11] ss:$0 sm:$0xff] }
 0xecc   : > { %v2225_v33 = vmul.f32 %v2224_v29, %v2217_v30 }
 0xecd   : > { %3093 = vmatpush3.bf16.msra.mxu0 %v3325_v2 }
 0xece   : > { %2226 = vadd.xlane.f32.xlu0 %v2225_v33  ;;  %v2228_v34 = vmul.f32 %v2225_v33, %v2225_v33  ;;  %3094 = vmatprep.subr.bf16.mxu0 %v3564_v0 }
 0xed0   : > { %2229 = vadd.xlane.f32.xlu1 %v2228_v34  ;;  %v2810_v34 = vld [vmem:[#allocation7 + $0x1a] ss:$0 sm:$0xff] }
 0xed1   : > { %3095 = vmatpush3.bf16.msra.mxu0 %v3326_v15 }
 0xed2   : > { %3096 = vmatprep.subr.bf16.mxu0 %v3564_v0 }
 0xed5   : > { %3097 = vmatpush3.bf16.msra.mxu0 %v3327_v37 }
 0xed6   : > { %3098 = vmatprep.subr.bf16.mxu0 %v3564_v0 }
 0xed9   : > { %3099 = vmatpush3.bf16.msra.mxu0 %v3328_v1 }
 0xf5b   : > { %v2227_v23 = vpop.xlane.xlu0 %2226 }
 0xf5c   : > { %v2231_v38 = vmul.f32 0.0078125, %v2227_v23 }
 0xf5d   : > { %v2230_v39 = vpop.xlane.xlu1 %2229 }
 0xf5e   : > { %v2233_v40 = vmul.f32 %v2231_v38, %v2231_v38  ;;  %v2232_v41 = vmul.f32 0.0078125, %v2230_v39  ;;  %v2235_v14 = vsub.f32 %v2225_v33, %v2231_v38  ;;  %v2819_v39 = vld [vmem:[#allocation7 + $0x26] ss:$0 sm:$0xff] }
 0xf60   : > { %v2234_v42 = vsub.f32 %v2232_v41, %v2233_v40 }
 0xf62   : > { %v2236_v63 = vadd.f32 1e-05, %v2234_v42 }
 0xf64   : > { %3387 = vrsqrt.f32 %v2236_v63 }
 0xf6e   : > { %v3388_v43 = vpop.eup %3387 }
 0xf6f   : > { %v2238_v45 = vmul.f32 %v3388_v43, %v2235_v14 }
 0xf71   : > { %v2244_v8 = vmul.f32 %v2797_v44, %v2238_v45 }
 0xf73   : > { %v2250_v19 = vadd.f32 %v2798_v32, %v2244_v8 }
 0xf75   : > { %v2251_v46 = vmax.f32 %v2250_v19, -60.0 }
 0xf77   : > { %v2252_v61 = vsub.f32 0.0, %v2251_v46 }
 0xf79   : > { %v2253_v47 = vmul.f32 1.442695, %v2252_v61 }
 0xf7b   : > { %3389 = vpow2.f32 %v2253_v47 }
 0xf85   : > { %v3390_v48 = vpop.eup %3389 }
 0xf86   : > { %v2255_v49 = vadd.f32 1.0, %v3390_v48 }
 0xf88   : > { %3391 = vrcp.f32 %v2255_v49 }
 0xf92   : > { %v3392_v50 = vpop.eup %3391 }
 0xf93   : > { %v2257_v51 = vmul.f32 %v3392_v50, %v2250_v19 }
 0xf95   : > { %v2258_v52 = vpack.c.bf16 %v2257_v51, %v2257_v51 }
 0xf97   : > { %3101 = vmatmul.mubr.bf16.vlgmr.msra.gmra.mrb[40].mxu0 %v2258_v52 }
0x106a   : > { %v2358_v55 = vpop.f32.mrb[40].mxu0 }
0x106b   : > { %v2359_v57 = vadd.f32 %v2358_v55, %v3944_v26  ;;  %v3102_v58 = vpop.f32.mrb[41].mxu0  ;;  %v3332_v26 = vld [vmem:[#allocation5 + $0x218] sm:$0xff]  }
0x106c   : > { %v2361_v9 = vpop.f32.mrb[42].mxu0  ;;  %3111 = vmatpush3.bf16.msra.mxu1 %v3332_v26 }
0x106d   : > { %v2369_v59 = vadd.f32 %v2807_v56, %v2359_v57  ;;  %v3103_v60 = vpop.f32.mrb[43].mxu0  ;;  %3112 = vmatprep.subr.bf16.mxu1 %v3564_v0 }
0x106f   : > { %v2377_v62 = vmul.f32 %v2376_v22, %v2369_v59 }
0x1070   : > { %3113 = vmatpush3.bf16.msra.mxu1 %v3333_v6 }
0x1071   : > { %2378 = vadd.xlane.f32.xlu0 %v2377_v62  ;;  %v2380_v3 = vmul.f32 %v2377_v62, %v2377_v62  ;;  %3114 = vmatprep.subr.bf16.mxu1 %v3564_v0 }
0x1073   : > { %2381 = vadd.xlane.f32.xlu1 %v2380_v3 }
0x1074   : > { %3115 = vmatpush3.bf16.msra.mxu1 %v3334_v11 }
0x1075   : > { %3116 = vmatprep.subr.bf16.mxu1 %v3564_v0 }
0x1078   : > { %3117 = vmatpush3.bf16.msra.mxu1 %v3335_v12 }
0x1079   : > { %3118 = vmatprep.subr.bf16.mxu1 %v3564_v0 }
0x107c   : > { %3119 = vmatpush3.bf16.msra.mxu1 %v3336_v13 }
0x10fe   : > { %v2379_v16 = vpop.xlane.xlu0 %2378 }
0x10ff   : > { %v2383_v17 = vmul.f32 0.0078125, %v2379_v16 }
0x1100   : > { %v2382_v7 = vpop.xlane.xlu1 %2381 }
0x1101   : > { %v2385_v21 = vmul.f32 %v2383_v17, %v2383_v17  ;;  %v2384_v24 = vmul.f32 0.0078125, %v2382_v7  ;;  %v2387_v29 = vsub.f32 %v2377_v62, %v2383_v17 }
0x1103   : > { %v2386_v25 = vsub.f32 %v2384_v24, %v2385_v21 }
0x1105   : > { %v2388_v28 = vadd.f32 1e-05, %v2386_v25 }
0x1107   : > { %3393 = vrsqrt.f32 %v2388_v28 }
0x1111   : > { %v3394_v30 = vpop.eup %3393 }
0x1112   : > { %v2390_v33 = vmul.f32 %v3394_v30, %v2387_v29 }
0x1114   : > { %v2396_v35 = vmul.f32 %v2809_v31, %v2390_v33 }
0x1116   : > { %v2402_v36 = vadd.f32 %v2810_v34, %v2396_v35 }
0x1118   : > { %v2403_v10 = vmax.f32 %v2402_v36, -60.0 }
0x111a   : > { %v2404_v0 = vsub.f32 0.0, %v2403_v10 }
0x111c   : > { %v2405_v20 = vmul.f32 1.442695, %v2404_v0 }
0x111e   : > { %3395 = vpow2.f32 %v2405_v20 }
0x1128   : > { %v3396_v2 = vpop.eup %3395 }
0x1129   : > { %v2407_v15 = vadd.f32 1.0, %v3396_v2 }
0x112b   : > { %3397 = vrcp.f32 %v2407_v15 }
0x1135   : > { %v3398_v37 = vpop.eup %3397 }
0x1136   : > { %v2409_v1 = vmul.f32 %v3398_v37, %v2402_v36 }
0x1138   : > { %v2410_v23 = vpack.c.bf16 %v2409_v1, %v2409_v1 }
0x113a   : > { %3121 = vmatmul.mubr.bf16.vlgmr.msra.gmra.mrb[36].mxu1 %v2410_v23 }
0x120d   : > { %v2510_v38 = vpop.f32.mrb[36].mxu1 }
0x120e   : > { %v2516_v40 = vadd.f32 %v2510_v38, %v3946_v27  ;;  %v3122_v41 = vpop.f32.mrb[37].mxu1 }
0x120f   : > { %v2513_v42 = vpop.f32.mrb[38].mxu1 }
0x1210   : > { %v2522_v63 = vadd.f32 %v2819_v39, %v2516_v40  ;;  %v3123_v14 = vpop.f32.mrb[39].mxu1 }
0x1212   : > { %2523 = vst.msk [vmem:[%s326_s18] sm:$0xff] %vm448_vm2, %v2522_v63 }
0x1213   : > { %3496 = shalt.err (!%p3493_p11)
}
0x1214   : > { %s3497_s22 = scalar_lea.hbm %s4032_s5, 128  ;;  %s3501_s9 = scalar_lea.hbm %s4082_s7, 256 }
0x1215   : > { %p3498_p13 = scmp.ne.s32.totalorder %s4032_s5, %s3497_s22  ;;  %p3502_p6 = scmp.lt.u32.totalorder %s4032_s5, %s4082_s7 }
0x1216   : > { %p3503_p9 = scmp.lt.u32.totalorder %s3501_s9, %s3497_s22  ;;  %p3505_p10 = scmp.lt.u32.totalorder %s3497_s22, %s4032_s5 }
0x1217   : > { %p3499_p5 = pnand %p3498_p13, %p4101_p1 }
0x1218   : > { %p3504_p12 = por %p3503_p9, %p3502_p6 }
0x1219   : > { %p3500_p0 = pneg %p3499_p5 }
0x121a   : > { %p3506_p2 = por %p3505_p10, %p3504_p12 }
0x121c   : > { %p3507_p3 = pnand %p3506_p2, %p3500_p0 }
0x121e   : > { %3510 = shalt.err (!%p3507_p3)
}
0x121f   : > { %3136 = dma.vmem_to_hbm [thread:$0]  (%p4101_p1), %s4034_s10, 128, %s4032_s5, %s2525_s28  }
0x1220 PF: > { %p3158_p4 = scmp.ge.s32.totalorder %s3553_s27, 2  ;;  %s2550_s13 = sand.u32 1, %s3541_s24  }
0x1221   : > { %p4102_p7 = scmp.ne.s32.totalorder %s4091_s12, 0  ;;  %s2551_s21 = scalar_lea.sflag [#allocation4], %s2550_s13 }
0x1223   : > { %p3149_p8 = pnand %p3158_p4, %p4102_p7 }
0x1225   : > { %3536 = dma.done.wait (!%p3149_p8), %s2551_s21, 128  }
0x1226   : > { %3538 = vsyncadd (!%p3149_p8), %s2551_s21, 4294967168  ;;  %s4103_s18 = sld [smem:[#allocation12_spill]]  ;;  %s4104_s26 = sld [smem:[#allocation13_spill]] }
0x1227   : > { %p19_p11 = scmp.ge.s32.totalorder %s3633_s30, 4   ;;  %s4105_s24 = smov %s3545_s25 }
0x1228   : > { %s4107_s27 = smov %s3633_s30 }
0x1229   :  { %21 = sbr.rel (!%p19_p11) target bundleno = 7 (0x7), region = 107 }
0x122c   : > { %s4106_s25 = smov %s4103_s18 }
0x1230   :  { %2556 = vsyncpa [#allocation3], 1 }
0x1231   :  { %2558 = vsyncpa [#allocation3 + $0x1], 1 }
0x1232   :  { %2559 = vsyncpa [#allocation6], 1 }
0x1233   :  { %2560 = vsyncpa [#allocation4], 1 }
0x1234   :  { %2562 = vsyncpa [#allocation4 + $0x1], 1 }

</bundles_post_ra>
